<compile_context>
chip_gen: v7x
topology: tpu7x:2x2x1
jax: 0.10.0
libtpu: 0.0.40
codegen_flags: <defaults>
</compile_context>

<pallas_src>
import math
import jax
import jax.numpy as jnp
from jax import lax
from jax.experimental import pallas as pl
from jax.experimental.pallas import tpu as pltpu

HIDDEN = 32                 # self.hidden_dim
SCALE = 2.0 * math.pi       # self.scale


def _pick_tile(hw, requested=None):
    """Pick a lane-aligned tile of the flattened H*W axis (>=2 tiles when possible)."""
    if requested is not None:
        assert requested == hw or requested % 128 == 0, \
            "tile_hw must be a multiple of 128 (or equal to H*W)"
        return requested
    if hw <= 128:
        return hw                       # single full-extent block
    for t in (2048, 1024, 512, 256, 128):
        if hw > t:                      # strict '>' guarantees >= 2 tiles
            return t
    return 128


def positional_encoding_fourier(B, H, W, weight, bias, *, tile_hw=None):
    """weight: (dim, 2*HIDDEN) 1x1-conv weight (kernel dims squeezed), bias: (dim,).

    Returns (B, dim, H, W) float32, matching the PyTorch module output
    (batch-invariant values, broadcast across B).
    """
    dim = weight.shape[0]
    HW = H * W
    # f32 row/col derivation (floor((idx+0.5)/W)) is exact only well below 2^23.
    assert HW < (1 << 22), "H*W too large for the f32 index math; use int div/mod"

    TILE = _pick_tile(HW, tile_hw)
    num_tiles = pl.cdiv(HW, TILE)
    # Chunk the (2*HIDDEN, TILE) sin intermediate to bound vreg pressure.
    CHUNK = 512 if (TILE >= 1024 and TILE % 512 == 0) else TILE
    n_chunks = TILE // CHUNK

    w_bf16 = jnp.asarray(weight, jnp.bfloat16)                # (dim, 2*HIDDEN)
    b_col = jnp.asarray(bias, jnp.float32).reshape(dim, 1)    # (dim, 1)

    # Host-side per-channel constant table:
    #   col 0: y-embed scale (1/dim_t on rows 0..HIDDEN-1, else 0)
    #   col 1: x-embed scale (1/dim_t on rows HIDDEN..2*HIDDEN-1, else 0)
    #   col 2: sine phase ((k % 2) * pi/2  ->  even=sin, odd=cos)
    kf = jnp.arange(HIDDEN, dtype=jnp.float32)
    inv_dt = 1.0 / (10000.0 ** (2.0 * jnp.floor(kf / 2.0) / HIDDEN))
    phase = (jnp.arange(HIDDEN) % 2).astype(jnp.float32) * (math.pi / 2.0)
    zeros = jnp.zeros_like(inv_dt)
    consts = jnp.stack(
        [jnp.concatenate([inv_dt, zeros]),      # y channels first (torch cat order)
         jnp.concatenate([zeros, inv_dt]),      # then x channels
         jnp.concatenate([phase, phase])],
        axis=1)                                  # (2*HIDDEN, 3)

    inv_w = 1.0 / float(W)
    y_norm = SCALE / (float(H) + 1e-6)
    x_norm = SCALE / (float(W) + 1e-6)

    def kernel(w_ref, bias_ref, c_ref, o_ref):
        # w_ref   : (dim, 2*HIDDEN) bf16 conv weight
        # bias_ref: (dim, 1)        f32 conv bias
        # c_ref   : (2*HIDDEN, 3)   f32 constant table
        # o_ref   : (dim, TILE)     f32 output block
        t = pl.program_id(0)                       # top level only
        tile_base = (t * TILE).astype(jnp.float32)

        def emit_chunk(startf):
            # Flat pixel index for each lane of this chunk.
            idx = lax.broadcasted_iota(jnp.int32, (1, CHUNK), 1).astype(jnp.float32)
            idx = idx + startf
            rowf = jnp.floor((idx + 0.5) * inv_w)          # idx // W (f32 trick)
            colf = idx - rowf * float(W)                   # idx %  W
            y_emb = (rowf + 1.0) * y_norm                  # (1, CHUNK)
            x_emb = (colf + 1.0) * x_norm                  # (1, CHUNK)
            # (2*HIDDEN, 1) columns broadcast against (1, CHUNK) pixel rows.
            arg = (c_ref[:, 0:1] * y_emb
                   + c_ref[:, 1:2] * x_emb
                   + c_ref[:, 2:3])
            pos = jnp.sin(arg).astype(jnp.bfloat16)        # (2*HIDDEN, CHUNK)
            return (jnp.dot(w_ref[...], pos,
                            preferred_element_type=jnp.float32)
                    + bias_ref[...])                       # (dim, CHUNK) f32

        if n_chunks == 1:
            o_ref[...] = emit_chunk(tile_base)
        else:
            def body(c, carry):
                start = c * CHUNK
                o_ref[:, pl.ds(start, CHUNK)] = emit_chunk(
                    tile_base + start.astype(jnp.float32))
                return carry
            lax.fori_loop(0, n_chunks, body, 0)

    cost = pl.CostEstimate(
        flops=2 * dim * (2 * HIDDEN) * HW,
        transcendentals=(2 * HIDDEN) * HW,
        bytes_accessed=dim * HW * 4 + dim * (2 * HIDDEN) * 2 + dim * 4
                       + (2 * HIDDEN) * 3 * 4)

    pos_map = pl.pallas_call(
        kernel,
        out_shape=jax.ShapeDtypeStruct((dim, HW), jnp.float32),
        grid_spec=pltpu.PrefetchScalarGridSpec(
            num_scalar_prefetch=0,
            grid=(num_tiles,),
            in_specs=[
                pl.BlockSpec((dim, 2 * HIDDEN), lambda t: (0, 0)),
                pl.BlockSpec((dim, 1), lambda t: (0, 0)),
                pl.BlockSpec((2 * HIDDEN, 3), lambda t: (0, 0)),
            ],
            out_specs=pl.BlockSpec((dim, TILE), lambda t: (0, t)),
        ),
        compiler_params=pltpu.CompilerParams(
            dimension_semantics=("parallel",),
            vmem_limit_bytes=32 << 20),
        cost_estimate=cost,
    )(w_bf16, b_col, consts)

    # Batch-invariant: broadcast (no extra HBM pass; consumers can fuse it).
    pos_map = pos_map.reshape(1, dim, H, W)
    return jnp.broadcast_to(pos_map, (B, dim, H, W))


def _reference(B, H, W, weight, bias):
    """Pure-JAX re-implementation of the torch forward, for verification."""
    ones = jnp.ones((B, H, W), jnp.float32)
    y_embed = jnp.cumsum(ones, axis=1)
    x_embed = jnp.cumsum(ones, axis=2)
    y_embed = y_embed / (y_embed[:, -1:, :] + 1e-6) * SCALE
    x_embed = x_embed / (x_embed[:, :, -1:] + 1e-6) * SCALE
    k = jnp.arange(HIDDEN, dtype=jnp.float32)
    dim_t = 10000.0 ** (2.0 * jnp.floor(k / 2.0) / HIDDEN)
    pos_x = x_embed[..., None] / dim_t
    pos_y = y_embed[..., None] / dim_t
    pos_x = jnp.stack([jnp.sin(pos_x[..., 0::2]), jnp.cos(pos_x[..., 1::2])],
                      axis=4).reshape(B, H, W, HIDDEN)
    pos_y = jnp.stack([jnp.sin(pos_y[..., 0::2]), jnp.cos(pos_y[..., 1::2])],
                      axis=4).reshape(B, H, W, HIDDEN)
    pos = jnp.concatenate([pos_y, pos_x], axis=3)              # (B, H, W, 64)
    out = jnp.einsum("bhwc,dc->bdhw", pos, weight,
                     precision=lax.Precision.HIGHEST)
    return out + bias[None, :, None, None]


if __name__ == "__main__":
    key = jax.random.PRNGKey(0)

    def make_params(dim, k):
        kw, kb = jax.random.split(k)
        weight = jax.random.normal(kw, (dim, 2 * HIDDEN), jnp.float32) * 0.02
        bias = jax.random.normal(kb, (dim,), jnp.float32) * 0.02
        return weight, bias

    cases = [
        # (B, H, W, dim, tile_hw)
        (2, 16, 16, 64, None),    # HW=256  -> 2 even 128-tiles, straight-line path
        (1, 14, 14, 96, None),    # HW=196  -> 2 tiles, ragged (masked) last block
        (2, 32, 32, 64, 1024),    # HW=1024 -> single tile, 2-chunk fori_loop path
    ]
    for i, (B, H, W, dim, tile_hw) in enumerate(cases):
        key, sub = jax.random.split(key)
        weight, bias = make_params(dim, sub)
        out = positional_encoding_fourier(B, H, W, weight, bias, tile_hw=tile_hw)
        out = jax.block_until_ready(out)
        ref = _reference(B, H, W, weight, bias)
        assert out.shape == (B, dim, H, W), (i, out.shape)
        err = float(jnp.max(jnp.abs(out - ref)))
        # bf16 single-pass MXU matmul (f32 accumulate) => ~1e-3-scale abs error.
        assert jnp.allclose(out, ref, rtol=2e-2, atol=2e-2), (i, err)

    print("KERNEL_OK")
</pallas_src>

<mosaic_0001>
module attributes {stable_mosaic.version = 11 : i64} {
  func.func @kernel(%arg0: i32, %arg1: memref<64x64xbf16, #tpu.memory_space<vmem>>, %arg2: memref<64x1xf32, #tpu.memory_space<vmem>>, %arg3: memref<64x3xf32, #tpu.memory_space<vmem>>, %arg4: memref<64x128xf32, #tpu.memory_space<vmem>>) attributes {dimension_semantics = [#tpu.dimension_semantics<parallel>], iteration_bounds = array<i64: 2>, scalar_prefetch = 0 : i64, scratch_operands = 0 : i64, tpu.core_type = #tpu.core_type<tc>, window_params = [{pipeline_mode = #tpu.pipeline_mode<synchronous>, transform_indices = @transform_0, window_bounds = array<i64: 64, 64>}, {pipeline_mode = #tpu.pipeline_mode<synchronous>, transform_indices = @transform_1, window_bounds = array<i64: 64, 1>}, {pipeline_mode = #tpu.pipeline_mode<synchronous>, transform_indices = @transform_2, window_bounds = array<i64: 64, 3>}, {transform_indices = @transform_3, window_bounds = array<i64: 64, 128>}]} {
    %c128_i32 = arith.constant 128 : i32
    %0 = arith.muli %arg0, %c128_i32 : i32
    %1 = arith.sitofp %0 : i32 to f32
    %2 = tpu.iota {dimensions = array<i32: 1>} : vector<1x128xi32>
    %3 = arith.sitofp %2 : vector<1x128xi32> to vector<1x128xf32>
    %4 = vector.broadcast %1 : f32 to vector<1x128xf32>
    %5 = arith.addf %3, %4 : vector<1x128xf32>
    %cst = arith.constant 5.000000e-01 : f32
    %6 = vector.broadcast %cst : f32 to vector<1x128xf32>
    %7 = arith.addf %5, %6 : vector<1x128xf32>
    %cst_0 = arith.constant 6.250000e-02 : f32
    %8 = vector.broadcast %cst_0 : f32 to vector<1x128xf32>
    %9 = arith.mulf %7, %8 : vector<1x128xf32>
    %10 = math.floor %9 : vector<1x128xf32>
    %cst_1 = arith.constant 1.600000e+01 : f32
    %11 = vector.broadcast %cst_1 : f32 to vector<1x128xf32>
    %12 = arith.mulf %10, %11 : vector<1x128xf32>
    %13 = arith.subf %5, %12 : vector<1x128xf32>
    %cst_2 = arith.constant 1.000000e+00 : f32
    %14 = vector.broadcast %cst_2 : f32 to vector<1x128xf32>
    %15 = arith.addf %10, %14 : vector<1x128xf32>
    %cst_3 = arith.constant 0.392699063 : f32
    %16 = vector.broadcast %cst_3 : f32 to vector<1x128xf32>
    %17 = arith.mulf %15, %16 : vector<1x128xf32>
    %cst_4 = arith.constant 1.000000e+00 : f32
    %18 = vector.broadcast %cst_4 : f32 to vector<1x128xf32>
    %19 = arith.addf %13, %18 : vector<1x128xf32>
    %cst_5 = arith.constant 0.392699063 : f32
    %20 = vector.broadcast %cst_5 : f32 to vector<1x128xf32>
    %21 = arith.mulf %19, %20 : vector<1x128xf32>
    %c0 = arith.constant 0 : index
    %c0_6 = arith.constant 0 : index
    %22 = vector.load %arg3[%c0, %c0_6] : memref<64x3xf32, #tpu.memory_space<vmem>>, vector<64x1xf32>
    %23 = vector.broadcast %22 : vector<64x1xf32> to vector<64x128xf32>
    %24 = vector.broadcast %17 : vector<1x128xf32> to vector<64x128xf32>
    %25 = arith.mulf %23, %24 : vector<64x128xf32>
    %c0_7 = arith.constant 0 : index
    %c1 = arith.constant 1 : index
    %26 = vector.load %arg3[%c0_7, %c1] : memref<64x3xf32, #tpu.memory_space<vmem>>, vector<64x1xf32>
    %27 = vector.broadcast %26 : vector<64x1xf32> to vector<64x128xf32>
    %28 = vector.broadcast %21 : vector<1x128xf32> to vector<64x128xf32>
    %29 = arith.mulf %27, %28 : vector<64x128xf32>
    %30 = arith.addf %25, %29 : vector<64x128xf32>
    %c0_8 = arith.constant 0 : index
    %c2 = arith.constant 2 : index
    %31 = vector.load %arg3[%c0_8, %c2] : memref<64x3xf32, #tpu.memory_space<vmem>>, vector<64x1xf32>
    %32 = vector.broadcast %31 : vector<64x1xf32> to vector<64x128xf32>
    %33 = arith.addf %30, %32 : vector<64x128xf32>
    %34 = math.sin %33 : vector<64x128xf32>
    %35 = arith.truncf %34 : vector<64x128xf32> to vector<64x128xbf16>
    %c0_9 = arith.constant 0 : index
    %c0_10 = arith.constant 0 : index
    %36 = vector.load %arg1[%c0_9, %c0_10] : memref<64x64xbf16, #tpu.memory_space<vmem>>, vector<64x64xbf16>
    %cst_11 = arith.constant dense<0.000000e+00> : vector<64x128xf32>
    %37 = tpu.matmul %36, %35, %cst_11 {dimension_numbers = #tpu.dot_dimension_numbers<[1], [0], [0], [1], [0, 0, 1, 1], [], []>} : vector<64x64xbf16>, vector<64x128xbf16>, vector<64x128xf32> -> vector<64x128xf32>
    %c0_12 = arith.constant 0 : index
    %c0_13 = arith.constant 0 : index
    %38 = vector.load %arg2[%c0_12, %c0_13] : memref<64x1xf32, #tpu.memory_space<vmem>>, vector<64x1xf32>
    %39 = vector.broadcast %38 : vector<64x1xf32> to vector<64x128xf32>
    %40 = arith.addf %37, %39 : vector<64x128xf32>
    %c0_14 = arith.constant 0 : index
    %c0_15 = arith.constant 0 : index
    %41 = vector.load %arg4[%c0_14, %c0_15] : memref<64x128xf32, #tpu.memory_space<vmem>>, vector<64x128xf32>
    tpu.vector_store %arg4[%c0_14, %c0_15], %40 {strides = array<i32>} : memref<64x128xf32, #tpu.memory_space<vmem>>, vector<64x128xf32>,
    return
  }
  func.func @transform_0(%arg0: i32) -> (i32, i32) {
    %c0_i32 = arith.constant 0 : i32
    %c0_i32_0 = arith.constant 0 : i32
    %c0_i32_1 = arith.constant 0 : i32
    return %c0_i32, %c0_i32_0 : i32, i32
  }
  func.func @transform_1(%arg0: i32) -> (i32, i32) {
    %c0_i32 = arith.constant 0 : i32
    %c0_i32_0 = arith.constant 0 : i32
    %c0_i32_1 = arith.constant 0 : i32
    return %c0_i32, %c0_i32_0 : i32, i32
  }
  func.func @transform_2(%arg0: i32) -> (i32, i32) {
    %c0_i32 = arith.constant 0 : i32
    %c0_i32_0 = arith.constant 0 : i32
    %c0_i32_1 = arith.constant 0 : i32
    return %c0_i32, %c0_i32_0 : i32, i32
  }
  func.func @transform_3(%arg0: i32) -> (i32, i32) {
    %c0_i32 = arith.constant 0 : i32
    %c0_i32_0 = arith.constant 0 : i32
    return %c0_i32, %arg0 : i32, i32
  }
}

</mosaic_0001>

<bundles_post_ra>
// kernel: tpu_custom_call.1
= control target key start
LH: loop header
LB: loop body
LE: loop exit
PB: predicated region body
PF: predicated region fallthrough
CT: control target
= control target key end

     0   :  { %8 = vsyncpa [#allocation3], 0  ;;  %s2592_s0 = inlined_call_operand.vmem [shape: bf16[64,64], index: 0, kind: input, shape index: {}]   ;;  %s2593_s1 = inlined_call_operand.vmem [shape: f32[64,1], index: 1, kind: input, shape index: {}]   ;;  %s2594_s2 = inlined_call_operand.vmem [shape: f32[64,3], index: 2, kind: input, shape index: {}]   ;;  %s2595_s3 = inlined_call_operand.hbm [shape: f32[64,256], index: 3, kind: output, shape index: {}]  }
   0x1   :  { %10 = vsyncpa [#allocation3 + $0x1], 0  ;;  %s1683_s12 = smov 0   ;;  %s1685_s13 = smov 0  }
   0x2   :  { %s1687_s14 = smov 0   ;;  %s1689_s15 = smov 0  }
   0x3 LB: > { %s1370_s16 = sadd.s32 4294967295, %s1648_s15   ;;  %s1371_s17 = sadd.s32 4294967294, %s1648_s15   ;;  %s1648_s15 = sphi %s1689_s15, %s2615_s15   ;;  %s1644_s14 = sphi %s1687_s14, %s2614_s14   ;;  %s1640_s13 = sphi %s1685_s13, %s2613_s13   ;;  %s1636_s12 = sphi %s1683_s12, %s2612_s12  }
   0x4   : > { %s1706_s18 = sadd.s32 1, %s1648_s15   ;;  %s86_s19 = sadd.s32 1, %s1644_s14 }
   0x5   : > { %s83_s20 = ssub.s32 %s1648_s15, %s1706_s18  ;;  %p96_p0 = scmp.ne.s32.totalorder %s1644_s14, %s1640_s13 }
   0x6   : > { %p84_p1 = scmp.eq.s32.totalorder %s83_s20, 0  ;;  %p97_p2 = scmp.eq.s32.totalorder %s1370_s16, 1 }
   0x7   : > { %p102_p3 = scmp.ne.s32.totalorder %s1640_s13, %s1636_s12  ;;  %p103_p4 = scmp.eq.s32.totalorder %s1371_s17, 1 }
   0x8   : > { %s1718_s21 = scalar_select %p84_p1, %s1644_s14, %s86_s19  }
   0x9   : > { %p1720_p5 = por %p97_p2, %p96_p0  ;;  %p1724_p6 = por %p103_p4, %p102_p3 }
   0xa   : > { %p1373_p7 = scmp.ge.s32.totalorder %s1648_s15, 1  ;;  %p130_p8 = scmp.lt.s32.totalorder %s1648_s15, 3 }
   0xc   : > { %p131_p9 = pnand %p1373_p7, %p130_p8 }
   0xd   : > { %v166_v0 = vld [vmem:[%s2594_s2] sm:$0xff] (!%p131_p9)  ;;  %v1650_v1 = vmov (!%p131_p9), 1   ;;  %v1651_v2 = vmov (!%p131_p9), 0   ;;  %v167_v3 = vld [vmem:[%s2594_s2 + $0x8] sm:$0xff] (!%p131_p9)  ;;  %v168_v4 = vld [vmem:[%s2594_s2 + $0x10] sm:$0xff] (!%p131_p9)  ;;  %v1652_v7 = vmov (!%p131_p9), 2   ;;  %v152_v11 = vlaneseq (!%p131_p9) }
   0xe   : > { %134 = sbr.rel (%p131_p9) target bundleno = 636 (0x27c), region = 32  ;;  %1536 = vset.pattern.permute.xlu1 (!%p131_p9), %v1650_v1  ;;  %1535 = vset.pattern.permute.xlu0 (!%p131_p9), %v1651_v2  ;;  %v169_v5 = vld [vmem:[%s2594_s2 + $0x18] sm:$0xff] (!%p131_p9)  ;;  %v170_v6 = vld [vmem:[%s2594_s2 + $0x20] sm:$0xff] (!%p131_p9)  ;;  %v172_v8 = vld [vmem:[%s2594_s2 + $0x30] sm:$0xff] (!%p131_p9)  ;;  %s1756_s19 = sshll.u32 (!%p131_p9), %s1370_s16, 7 }
   0xf   : > { %223 = vperm.xlu1 (!%p131_p9), %1536, %v166_v0   ;;  %176 = vperm.xlu0 (!%p131_p9), %1535, %v166_v0   ;;  %v171_v9 = vld [vmem:[%s2594_s2 + $0x28] sm:$0xff] (!%p131_p9)  ;;  %v173_v10 = vld [vmem:[%s2594_s2 + $0x38] sm:$0xff] (!%p131_p9)  ;;  %v153_v12 = vand.u32 (!%p131_p9), 127, %v152_v11  ;;  %s151_s20 = scvt.s32.f32 (!%p131_p9), %s1756_s19  ;;  %s146_s29 = sand.u32 (!%p131_p9), 1, %s1640_s13  }
  0x10   : > { %s1374_s30 = sshll.u32 (!%p131_p9), %s146_s29, 6  ;;  %s2545_s8 = scalar_lea.hbm (!%p131_p9), %s2595_s3, %s1756_s19 }
  0x11   : > { %v154_v13 = vcvt.s32.f32 (!%p131_p9), %v153_v12  ;;  %v155_v14 = vstv (!%p131_p9), %s151_s20  ;;  %s148_s4 = scalar_lea.vmem (!%p131_p9), [#allocation2], %s1374_s30  ;;  %s2551_s19 = scalar_lea.sflag (!%p131_p9), [#allocation3], %s146_s29 }
  0x12   : > { %s1321_s5 = sshll.u32 (!%p131_p9), %s148_s4, 4  ;;  %s1659_s10 = smov (!%p131_p9), [#allocation2]   ;;  %s2547_s5 = int_to_ptr.vmem [resolvable:$true] %s1321_s5 }
  0x13   : > { %227 = vperm.xlu1 (!%p131_p9), %1536, %v167_v3   ;;  %181 = vperm.xlu0 (!%p131_p9), %1535, %v167_v3   ;;  %v156_v15 = vadd.f32 (!%p131_p9), %v155_v14, %v154_v13  ;;  %s1586_s9 = scalar_lea.vmem (!%p131_p9), %s2547_s5, 1024  ;;  %s1590_s11 = sshll.u32 (!%p131_p9), %s1659_s10, 4  ;;  %s1591_s11 = int_to_ptr.vmem [resolvable:$false] %s1590_s11 }
  0x14   : > { %p1587_p10 = scmp.ne.s32.totalorder (!%p131_p9), %s2547_s5, %s1586_s9  ;;  %s1592_s17 = scalar_lea.vmem (!%p131_p9), %s1591_s11, 2048 }
  0x15   : > { %v157_v16 = vadd.f32 0.5, %v156_v15  ;;  %p1593_p13 = scmp.lt.s32.totalorder %s2547_s5, %s1591_s11  ;;  %p1594_p0 = scmp.lt.s32.totalorder %s1592_s17, %s1586_s9 }
  0x16   : > { %p1588_p11 = pnand %p1587_p10, %p1720_p5 }
  0x17   : > { %1537 = vset.pattern.permute.xlu1 %v1651_v2  ;;  %186 = vperm.xlu0 %1535, %v168_v4   ;;  %v158_v17 = vmul.f32 0.0625, %v157_v16  ;;  %p1595_p1 = por %p1594_p0, %p1593_p13 }
  0x18   : > { %191 = vperm.xlu1 %1537, %v169_v5   ;;  %p1589_p12 = pneg %p1588_p11 }
  0x19   : > { %v159_v18 = vfloor.f32 %v158_v17 }
  0x1a   : > { %p1596_p2 = pnand %p1595_p1, %p1589_p12 }
  0x1b   : > { %1538 = vset.pattern.permute.xlu0 %v1650_v1  ;;  %v160_v19 = vmul.f32 16.0, %v159_v18  ;;  %v162_v26 = vadd.f32 1.0, %v159_v18 }
  0x1c   : > { %1539 = vset.pattern.permute.xlu1 %v1650_v1  ;;  %231 = vperm.xlu0 %1538, %v168_v4  }
  0x1d   : > { %235 = vperm.xlu1 %1539, %v169_v5   ;;  %v161_v22 = vsub.f32 %v156_v15, %v160_v19  ;;  %v1763_v30 = vmul.f32 0.39269906, %v162_v26  ;;  %v1657_v15 = vmov 920167782   ;;  %v1658_v19 = vmov 1326507024  }
  0x1f   : > { %v164_v25 = vadd.f32 1.0, %v161_v22 }
  0x20   : > { %239 = vperm.xlu0 %1538, %v170_v6  }
  0x21   : > { %1540 = vset.pattern.permute.xlu1 %v1652_v7  ;;  %v1761_v29 = vmul.f32 0.39269906, %v164_v25 }
  0x22   : > { %271 = vperm.xlu1 %1540, %v166_v0  }
  0x24   : > { %247 = vperm.xlu0 %1538, %v172_v8  }
  0x26   : > { %1541 = vset.pattern.permute.xlu1 %v1651_v2 }
  0x27   : > { %196 = vperm.xlu1 %1541, %v170_v6  }
  0x28   : > { %1545 = vset.pattern.permute.xlu0 %v1652_v7 }
  0x29   : > { %275 = vperm.xlu0 %1545, %v167_v3  }
  0x2b   : > { %201 = vperm.xlu1 %1541, %v171_v9  }
  0x2d   : > { %283 = vperm.xlu0 %1545, %v169_v5  }
  0x2f   : > { %1542 = vset.pattern.permute.xlu1 %v1650_v1 }
  0x30   : > { %243 = vperm.xlu1 %1542, %v171_v9  }
  0x31   : > { %291 = vperm.xlu0 %1545, %v171_v9  }
  0x34   : > { %1543 = vset.pattern.permute.xlu1 %v1652_v7 }
  0x35   : > { %279 = vperm.xlu1 %1543, %v168_v4   ;;  %1548 = vset.pattern.permute.xlu0 %v1651_v2  ;;  %v1653_v4 = vmov 683565275  }
  0x39   : > { %1544 = vset.pattern.permute.xlu1 %v1651_v2 }
  0x3a   : > { %206 = vperm.xlu1 %1544, %v172_v8  }
  0x3e   : > { %211 = vperm.xlu1 %1544, %v173_v10  }
  0x42   : > { %1546 = vset.pattern.permute.xlu1 %v1650_v1 }
  0x43   : > { %251 = vperm.xlu1 %1546, %v173_v10  }
  0x47   : > { %1547 = vset.pattern.permute.xlu1 %v1652_v7 }
  0x48   : > { %287 = vperm.xlu1 %1547, %v170_v6   ;;  %v1654_v6 = vmov 2475754826  }
  0x4c   : > { %295 = vperm.xlu1 %1547, %v172_v8   ;;  %v1655_v8 = vmov 2131351028  }
  0x50   : > { %299 = vperm.xlu1 %1547, %v173_v10   ;;  %v1656_v10 = vmov 2102212464  }
  0x54   : > { %1549 = vset.pattern.permute.xlu1 %v1651_v2 }
  0x8e   : > { %v224_v20 = vpop.permute.xlu1 %223  ;;  %v177_v21 = vpop.permute.xlu0 %176 }
  0x8f   : > { %v254_v32 = vmul.f32 %v224_v20, %v1761_v29  ;;  %v214_v33 = vmul.f32 %v177_v21, %v1763_v30 }
  0x91   : > { %v262_v36 = vadd.f32 %v254_v32, %v214_v33 }
  0x92   : > { %v228_v23 = vpop.permute.xlu1 %227  ;;  %v182_v24 = vpop.permute.xlu0 %181 }
  0x93   : > { %v255_v39 = vmul.f32 %v228_v23, %v1761_v29  ;;  %v215_v40 = vmul.f32 %v182_v24, %v1763_v30 }
  0x95   : > { %v263_v46 = vadd.f32 %v255_v39, %v215_v40 }
  0x96   : > { %v1759_v27 = vpop.permute.xlu0 %186 }
  0x97   : > { %v192_v28 = vpop.permute.xlu1 %191 }
  0x98   : > { %v217_v55 = vmul.f32 %v192_v28, %v1763_v30 }
  0x9b   : > { %v1765_v31 = vpop.permute.xlu0 %231 }
  0x9c   : > { %v236_v34 = vpop.permute.xlu1 %235 }
  0x9d   : > { %v257_v50 = vmul.f32 %v236_v34, %v1761_v29 }
  0x9f   : > { %v1769_v35 = vpop.permute.xlu0 %239  ;;  %v265_v61 = vadd.f32 %v257_v50, %v217_v55 }
  0xa1   : > { %v272_v37 = vpop.permute.xlu1 %271 }
  0xa2   : > { %v1771_v38 = vadd.f32 %v272_v37, %v262_v36 }
  0xa3   : > { %v1775_v41 = vpop.permute.xlu0 %247 }
  0xa4   : > { %v310_v42 = vand.u32 2147483647, %v1771_v38  ;;  %v313_v43 = vand.u32 2139095040, %v1771_v38 }
  0xa6   : > { %v314_v44 = vshrl.u32 %v313_v43, 23  ;;  %v317_v45 = vand.u32 8388607, %v310_v42  ;;  %v1815_v55 = vpop.permute.xlu1 %196 }
  0xa8   : > { %v1376_v47 = vadd.s32 4294967169, %v314_v44  ;;  %v276_v48 = vpop.permute.xlu0 %275  ;;  %v318_v52 = vor.u32 8388608, %v317_v45 }
  0xa9   : > { %v1781_v49 = vadd.f32 %v276_v48, %v263_v46 }
  0xaa   : > { %v320_v51 = vadd.s32 1, %v1376_v47  ;;  %v1789_v63 = vshll.u32 %v318_v52, 8 }
  0xab   : > { %v414_v53 = vand.u32 2147483647, %v1781_v49  ;;  %v417_v54 = vand.u32 2139095040, %v1781_v49 }
  0xac   : > { %vm321_vm0 = vcmp.gt.s32.totalorder %v320_v51, 0  ;;  %v284_v59 = vpop.permute.xlu0 %283 }
  0xad   : > { %v322_v56 = vsel %vm321_vm0, %v320_v51, 0  ;;  %v418_v57 = vshrl.u32 %v417_v54, 23  ;;  %v421_v58 = vand.u32 8388607, %v414_v53  ;;  %v1791_v3 = vadd.f32 %v284_v59, %v265_v61 }
  0xae   : > { %v324_v60 = vand.u32 31, %v322_v56  ;;  %v323_v62 = vshrl.u32 %v322_v56, 5 }
  0xaf   : > { %v1380_v1 = vadd.s32 4294967169, %v418_v57  ;;  %v422_v2 = vor.u32 8388608, %v421_v58  ;;  %v622_v59 = vand.u32 2147483647, %v1791_v3 }
  0xb0   : > { %v325_v0 = vsub.s32 32, %v324_v60  ;;  %v327_v5 = vshll.u32 %v1653_v4, %v324_v60  ;;  %v330_v7 = vshll.u32 %v1654_v6, %v324_v60  ;;  %v333_v9 = vshll.u32 %v1655_v8, %v324_v60 }
  0xb1   : > { %v336_v11 = vshll.u32 %v1656_v10, %v324_v60  ;;  %v339_v16 = vshll.u32 %v1657_v15, %v324_v60  ;;  %vm342_vm1 = vcmp.lt.s32.totalorder %v323_v62, 1  ;;  %v424_v24 = vadd.s32 1, %v1380_v1 }
  0xb2   : > { %v328_v12 = vshrl.u32 %v1654_v6, %v325_v0  ;;  %v331_v13 = vshrl.u32 %v1655_v8, %v325_v0  ;;  %v334_v14 = vshrl.u32 %v1656_v10, %v325_v0  ;;  %v326_v17 = vshrl.u32 %v1653_v4, %v325_v0 }
  0xb3   : > { %v337_v18 = vshrl.u32 %v1657_v15, %v325_v0  ;;  %v340_v20 = vshrl.u32 %v1658_v19, %v325_v0  ;;  %vm344_vm2 = vcmp.lt.s32.totalorder %v323_v62, 3  ;;  %vm345_vm3 = vcmp.lt.s32.totalorder %v323_v62, 4 }
  0xb4   : > { %v329_v21 = vor.u32 %v328_v12, %v327_v5  ;;  %v332_v22 = vor.u32 %v331_v13, %v330_v7  ;;  %v335_v23 = vor.u32 %v334_v14, %v333_v9  ;;  %vm425_vm4 = vcmp.gt.s32.totalorder %v424_v24, 0 }
  0xb5   : > { %v338_v25 = vor.u32 %v337_v18, %v336_v11  ;;  %v341_v26 = vor.u32 %v340_v20, %v339_v16  ;;  %vm343_vm5 = vcmp.lt.s32.totalorder %v323_v62, 2  ;;  %v426_v44 = vsel %vm425_vm4, %v424_v24, 0 }
  0xb6   : > { %v346_v28 = vsel %vm342_vm1, %v326_v17, %v329_v21  ;;  %v347_v32 = vsel %vm345_vm3, %v335_v23, 2102212464  ;;  %v350_v33 = vsel %vm342_vm1, %v329_v21, %v332_v22  ;;  %v354_v34 = vsel %vm342_vm1, %v332_v22, %v335_v23  ;;  %v202_v21 = vpop.permute.xlu1 %201 }
  0xb7   : > { %v348_v36 = vsel %vm344_vm2, %v332_v22, %v347_v32  ;;  %v351_v37 = vsel %vm345_vm3, %v338_v25, 920167782  ;;  %v355_v39 = vsel %vm345_vm3, %v341_v26, 1326507024  ;;  %v1804_v48 = vshrl.u32 %v426_v44, 5 }
  0xb8   : > { %v352_v40 = vsel %vm344_vm2, %v335_v23, %v351_v37  ;;  %v356_v43 = vsel %vm344_vm2, %v338_v25, %v355_v39  ;;  %v349_v45 = vsel %vm343_vm5, %v346_v28, %v348_v36  ;;  %v428_v56 = vand.u32 31, %v426_v44 }
  0xb9   : > { %v353_v46 = vsel %vm343_vm5, %v350_v33, %v352_v40  ;;  %v357_v47 = vsel %vm343_vm5, %v354_v34, %v356_v43  ;;  %v365_v57 = vmul.u32 %v1789_v63, %v349_v45  ;;  %v1818_v58 = vshll.u32 %v422_v2, 8 }
  0xba   : > { %v1807_v50 = vmul.u32.u64.low %v1789_v63, %v357_v47  ;;  %v1808_v51 = vmul.u32.u64.high %v1789_v63, %v357_v47, %v1807_v50  ;;  %v1811_v52 = vmul.u32.u64.low %v1789_v63, %v353_v46  ;;  %v1812_v54 = vmul.u32.u64.high %v1789_v63, %v353_v46, %v1811_v52 }
  0xbb   : > { %v429_v60 = vsub.s32 32, %v428_v56  ;;  %v431_v61 = vshll.u32 %v1653_v4, %v428_v56  ;;  %vm446_vm6 = vcmp.lt.s32.totalorder %v1804_v48, 1  ;;  %v625_v62 = vand.u32 2139095040, %v1791_v3 }
  0xbc   : > { %vm367_vm7 = vc.u32 %v1808_v51, %v1811_v52  ;;  %v368_v0 = vadd.s32 1, %v1812_v54  ;;  %v434_v1 = vshll.u32 %v1654_v6, %v428_v56  ;;  %v437_v63 = vshll.u32 %v1655_v8, %v428_v56 }
  0xbd   : > { %v432_v2 = vshrl.u32 %v1654_v6, %v429_v60  ;;  %v435_v5 = vshrl.u32 %v1655_v8, %v429_v60  ;;  %v438_v7 = vshrl.u32 %v1656_v10, %v429_v60  ;;  %v440_v9 = vshll.u32 %v1656_v10, %v428_v56 }
  0xbe   : > { %v369_v11 = vsel %vm367_vm7, %v368_v0, %v1812_v54  ;;  %v441_v12 = vshrl.u32 %v1657_v15, %v429_v60  ;;  %v443_v13 = vshll.u32 %v1657_v15, %v428_v56  ;;  %v444_v14 = vshrl.u32 %v1658_v19, %v429_v60 }
  0xbf   : > { %v370_v16 = vadd.s32 %v369_v11, %v365_v57  ;;  %v433_v17 = vor.u32 %v432_v2, %v431_v61  ;;  %v436_v18 = vor.u32 %v435_v5, %v434_v1  ;;  %v439_v20 = vor.u32 %v438_v7, %v437_v63  ;;  %v244_v57 = vpop.permute.xlu1 %243 }
  0xc0   : > { %v442_v22 = vor.u32 %v441_v12, %v440_v9  ;;  %v445_v23 = vor.u32 %v444_v14, %v443_v13  ;;  %vm448_vm8 = vcmp.lt.s32.totalorder %v1804_v48, 3  ;;  %v626_v24 = vshrl.u32 %v625_v62, 23 }
  0xc1   : > { %v371_v25 = vadd.s32 536870912, %v370_v16  ;;  %v430_v26 = vshrl.u32 %v1653_v4, %v429_v60  ;;  %vm449_vm9 = vcmp.lt.s32.totalorder %v1804_v48, 4  ;;  %v454_v28 = vsel %vm446_vm6, %v433_v17, %v436_v18 }
  0xc2   : > { %v451_v32 = vsel %vm449_vm9, %v439_v20, 2102212464  ;;  %v455_v33 = vsel %vm449_vm9, %v442_v22, 920167782  ;;  %v458_v34 = vsel %vm446_vm6, %v436_v18, %v439_v20  ;;  %v459_v36 = vsel %vm449_vm9, %v445_v23, 1326507024 }
  0xc3   : > { %v1844_v37 = vshrl.u32 %v371_v25, 30  ;;  %vm447_vm10 = vcmp.lt.s32.totalorder %v1804_v48, 2  ;;  %v456_v39 = vsel %vm448_vm8, %v439_v20, %v455_v33  ;;  %v460_v40 = vsel %vm448_vm8, %v442_v22, %v459_v36 }
  0xc4   : > { %v450_v43 = vsel %vm446_vm6, %v430_v26, %v433_v17  ;;  %v457_v44 = vsel %vm447_vm10, %v454_v28, %v456_v39  ;;  %v461_v45 = vsel %vm447_vm10, %v458_v34, %v460_v40  ;;  %v1388_v46 = vadd.s32 4294967169, %v626_v24 }
  0xc5   : > { %v373_v47 = vshll.u32 %v1844_v37, 30  ;;  %v452_v50 = vsel %vm448_vm8, %v436_v18, %v451_v32  ;;  %v1861_v54 = vmul.u32.u64.low %v1818_v58, %v461_v45  ;;  %v1862_v56 = vmul.u32.u64.high %v1818_v58, %v461_v45, %v1861_v54 }
  0xc6   : > { %v1865_v60 = vmul.u32.u64.low %v1818_v58, %v457_v44  ;;  %v1866_v61 = vmul.u32.u64.high %v1818_v58, %v457_v44, %v1865_v60  ;;  %v629_v62 = vand.u32 8388607, %v622_v59  ;;  %v632_v0 = vadd.s32 1, %v1388_v46 }
  0xc7   : > { %v1871_v1 = vsub.s32 %v370_v16, %v373_v47  ;;  %v216_v63 = vmul.f32 %v1759_v27, %v1763_v30  ;;  %v256_v2 = vmul.f32 %v1765_v31, %v1761_v29  ;;  %v453_v5 = vsel %vm447_vm10, %v450_v43, %v452_v50  ;;  %v280_v16 = vpop.permute.xlu1 %279  ;;  %v292_v47 = vpop.permute.xlu0 %291 }
  0xc8   : > { %vm633_vm11 = vcmp.gt.s32.totalorder %v632_v0, 0  ;;  %vm471_vm12 = vc.u32 %v1862_v56, %v1865_v60  ;;  %v472_v9 = vadd.s32 1, %v1866_v61  ;;  %v630_v11 = vor.u32 8388608, %v629_v62 }
  0xc9   : > { %v376_v7 = vsub.s32 0, %v1871_v1  ;;  %v634_v12 = vsel %vm633_vm11, %v632_v0, 0  ;;  %v469_v27 = vmul.u32 %v1818_v58, %v453_v5  ;;  %v259_v31 = vmul.f32 %v244_v57, %v1761_v29 }
  0xca   : > { %v636_v14 = vand.u32 31, %v634_v12  ;;  %v1888_v48 = vmul.f32 %v1769_v35, %v1761_v29  ;;  %v1892_v17 = vmul.f32 %v1775_v41, %v1761_v29  ;;  %v473_v18 = vsel %vm471_vm12, %v472_v9, %v1866_v61 }
  0xcb   : > { %v1377_v13 = vmin.u32 %v376_v7, %v1871_v1  ;;  %v264_v20 = vadd.f32 %v256_v2, %v216_v63  ;;  %v474_v23 = vadd.s32 %v473_v18, %v469_v27  ;;  %v219_v24 = vmul.f32 %v202_v21, %v1763_v30 }
  0xcc   : > { %v637_v58 = vsub.s32 32, %v636_v14  ;;  %v366_v25 = vadd.s32 %v1811_v52, %v1808_v51  ;;  %v1900_v26 = vmul.f32 %v1815_v55, %v1763_v30  ;;  %v1902_v35 = vshll.u32 %v630_v11, 8 }
  0xcd   : > { %v378_v22 = vclz %v1377_v13  ;;  %v1904_v28 = vadd.f32 %v280_v16, %v264_v20  ;;  %v475_v32 = vadd.s32 536870912, %v474_v23  ;;  %v1906_v33 = vshrl.u32 %v634_v12, 5 }
  0xce   : > { %v267_v34 = vadd.f32 %v259_v31, %v219_v24  ;;  %v640_v36 = vshrl.u32 %v1654_v6, %v637_v58  ;;  %v643_v21 = vshrl.u32 %v1655_v8, %v637_v58  ;;  %v646_v39 = vshrl.u32 %v1656_v10, %v637_v58  ;;  %v1928_v31 = vpop.permute.xlu1 %206 }
  0xcf   : > { %v1378_v41 = vadd.s32 4294967294, %v378_v22  ;;  %v649_v51 = vshrl.u32 %v1657_v15, %v637_v58  ;;  %v1912_v52 = vshrl.u32 %v475_v32, 30  ;;  %v639_v55 = vshll.u32 %v1653_v4, %v636_v14 }
  0xd0   : > { %v645_v40 = vshll.u32 %v1655_v8, %v636_v14  ;;  %v642_v44 = vshll.u32 %v1654_v6, %v636_v14  ;;  %v648_v45 = vshll.u32 %v1656_v10, %v636_v14  ;;  %v652_v46 = vshrl.u32 %v1658_v19, %v637_v58 }
  0xd1   : > { %vm1379_vm13 = vcmp.lt.s32.totalorder %v1378_v41, 0  ;;  %v477_v57 = vshll.u32 %v1912_v52, 30  ;;  %v641_v62 = vor.u32 %v640_v36, %v639_v55  ;;  %v651_v2 = vshll.u32 %v1657_v15, %v636_v14 }
  0xd2   : > { %v381_v43 = vsel %vm1379_vm13, 0, %v1378_v41  ;;  %v647_v61 = vor.u32 %v646_v39, %v645_v40  ;;  %v644_v0 = vor.u32 %v643_v21, %v642_v44  ;;  %v650_v63 = vor.u32 %v649_v51, %v648_v45  ;;  %v1950_v45 = vpop.permute.xlu1 %211 }
  0xd3   : > { %v382_v50 = vsub.s32 32, %v381_v43  ;;  %v386_v54 = vsub.s32 4294967266, %v381_v43  ;;  %v1921_v9 = vsub.s32 %v474_v23, %v477_v57  ;;  %v1923_v11 = vadd.f32 %v292_v47, %v267_v34 }
  0xd4   : > { %v383_v12 = vshll.u32 %v1871_v1, %v381_v43  ;;  %v638_v13 = vshrl.u32 %v1653_v4, %v637_v58  ;;  %v653_v27 = vor.u32 %v652_v46, %v651_v2  ;;  %vm657_vm14 = vcmp.lt.s32.totalorder %v1906_v33, 4 }
  0xd5   : > { %v384_v5 = vshrl.u32 %v366_v25, %v382_v50  ;;  %v387_v7 = vadd.s32 127, %v386_v54  ;;  %v480_v18 = vsub.s32 0, %v1921_v9  ;;  %vm654_vm15 = vcmp.lt.s32.totalorder %v1906_v33, 1 }
  0xd6   : > { %v659_v14 = vsel %vm657_vm14, %v647_v61, 2102212464  ;;  %vm655_vm0 = vcmp.lt.s32.totalorder %v1906_v33, 2  ;;  %v662_v22 = vsel %vm654_vm15, %v641_v62, %v644_v0  ;;  %v663_v1 = vsel %vm657_vm14, %v650_v63, 920167782 }
  0xd7   : > { %v388_v16 = vshll.u32 %v387_v7, 23  ;;  %v385_v20 = vor.u32 %v384_v5, %v383_v12  ;;  %v1381_v24 = vmin.u32 %v480_v18, %v1921_v9  ;;  %vm656_vm1 = vcmp.lt.s32.totalorder %v1906_v33, 3 }
  0xd8   : > { %v666_v58 = vsel %vm654_vm15, %v644_v0, %v647_v61  ;;  %v658_v25 = vsel %vm654_vm15, %v638_v13, %v641_v62  ;;  %v660_v41 = vsel %vm656_vm1, %v644_v0, %v659_v14  ;;  %v664_v32 = vsel %vm656_vm1, %v647_v61, %v663_v1 }
  0xd9   : > { %v389_v23 = vor.u32 4788187, %v388_v16  ;;  %v667_v34 = vsel %vm657_vm14, %v653_v27, 1326507024  ;;  %vm312_vm2 = vcmp.lt.s32.totalorder %v1771_v38, 0  ;;  %v482_v21 = vclz %v1381_v24 }
  0xda   : > { %v665_v39 = vsel %vm655_vm0, %v662_v22, %v664_v32  ;;  %v668_v51 = vsel %vm656_vm1, %v650_v63, %v667_v34  ;;  %v392_v55 = vcvt.s32.f32 %v385_v20  ;;  %v830_v54 = vand.u32 2147483647, %v1923_v11 }
  0xdb   : > { %v390_v36 = vand.u32 2147483647, %v389_v23  ;;  %v669_v40 = vsel %vm655_vm0, %v666_v58, %v668_v51  ;;  %v1947_v43 = vmul.u32.u64.low %v1902_v35, %v665_v39  ;;  %v1948_v44 = vmul.u32.u64.high %v1902_v35, %v665_v39, %v1947_v43 }
  0xdc   : > { %v1382_v46 = vadd.s32 4294967294, %v482_v21  ;;  %v1953_v47 = vmul.u32.u64.low %v1902_v35, %v669_v40  ;;  %v1954_v50 = vmul.u32.u64.high %v1902_v35, %v669_v40, %v1953_v47  ;;  %vm1959_vm3 = vcmp.le.f32.partialorder %v310_v42, 0.7853982 }
  0xdd   : > { %v393_v61 = vmul.f32 %v392_v55, %v390_v36  ;;  %v661_v62 = vsel %vm655_vm0, %v658_v25, %v660_v41  ;;  %v833_v0 = vand.u32 2139095040, %v1923_v11  ;;  %vm416_vm4 = vcmp.lt.s32.totalorder %v1781_v49, 0 }
  0xde   : > { %vm1383_vm5 = vcmp.lt.s32.totalorder %v1382_v46, 0  ;;  %v521_v63 = vand.u32 2139095040, %v1904_v28  ;;  %v266_v2 = vadd.f32 %v1888_v48, %v1900_v26  ;;  %v396_v5 = vsub.s32 4, %v1844_v37  ;;  %v1977_v48 = vpop.permute.xlu1 %251 }
  0xdf   : > { %v485_v42 = vsel %vm1383_vm5, 0, %v1382_v46  ;;  %v680_v7 = vadd.s32 1, %v1948_v44  ;;  %v834_v12 = vshrl.u32 %v833_v0, 23  ;;  %v500_v33 = vsub.s32 4, %v1912_v52 }
  0xe0   : > { %v490_v13 = vsub.s32 4294967266, %v485_v42  ;;  %v677_v27 = vmul.u32 %v1902_v35, %v661_v62  ;;  %v837_v16 = vand.u32 8388607, %v830_v54  ;;  %v394_v18 = vxor.u32 2147483648, %v393_v61 }
  0xe1   : > { %v486_v14 = vsub.s32 32, %v485_v42  ;;  %vm679_vm6 = vc.u32 %v1954_v50, %v1947_v43  ;;  %v1396_v20 = vadd.s32 4294967169, %v834_v12  ;;  %v518_v1 = vand.u32 2147483647, %v1904_v28 }
  0xe2   : > { %v491_v26 = vadd.s32 127, %v490_v13  ;;  %v681_v22 = vsel %vm679_vm6, %v680_v7, %v1948_v44  ;;  %v522_v23 = vshrl.u32 %v521_v63, 23  ;;  %v1984_v35 = vsel %vm312_vm2, %v396_v5, %v1844_v37  ;;  %v288_v46 = vpop.permute.xlu1 %287 }
  0xe3   : > { %v470_v24 = vadd.s32 %v1865_v60, %v1862_v56  ;;  %v682_v58 = vadd.s32 %v681_v22, %v677_v27  ;;  %v840_v25 = vadd.s32 1, %v1396_v20  ;;  %vm1990_vm7 = vcmp.le.f32.partialorder %v414_v53, 0.7853982 }
  0xe4   : > { %v492_v32 = vshll.u32 %v491_v26, 23  ;;  %v1997_v34 = vsel %vm416_vm4, %v500_v33, %v1912_v52  ;;  %v838_v36 = vor.u32 8388608, %v837_v16  ;;  %v395_v37 = vsel %vm312_vm2, %v394_v18, %v393_v61 }
  0xe5   : > { %v488_v21 = vshrl.u32 %v470_v24, %v486_v14  ;;  %v683_v56 = vadd.s32 536870912, %v682_v58  ;;  %vm841_vm8 = vcmp.gt.s32.totalorder %v840_v25, 0  ;;  %v399_v53 = vsel %vm1959_vm3, 0, %v1984_v35 }
  0xe6   : > { %v842_v60 = vsel %vm841_vm8, %v840_v25, 0  ;;  %v1384_v39 = vadd.s32 4294967169, %v522_v23  ;;  %v525_v51 = vand.u32 8388607, %v518_v1  ;;  %v487_v55 = vshll.u32 %v1921_v9, %v485_v42 }
  0xe7   : > { %v493_v52 = vor.u32 4788187, %v492_v32  ;;  %v2007_v40 = vshrl.u32 %v683_v56, 30  ;;  %v844_v44 = vand.u32 31, %v842_v60  ;;  %v2012_v47 = vsel %vm1959_vm3, %v1771_v38, %v395_v37 }
  0xe8   : > { %v503_v61 = vsel %vm1990_vm7, 0, %v1997_v34  ;;  %v2018_v62 = vadd.s32 %v1947_v43, %v1954_v50  ;;  %v2022_v9 = vmul.f32 %v1928_v31, %v1763_v30  ;;  %v489_v0 = vor.u32 %v488_v21, %v487_v55 }
  0xe9   : > { %v685_v63 = vshll.u32 %v2007_v40, 30  ;;  %v845_v5 = vsub.s32 32, %v844_v44  ;;  %v2025_v42 = vshll.u32 %v838_v36, 8  ;;  %v843_v7 = vshrl.u32 %v842_v60, 5 }
  0xea   : > { %v526_v12 = vor.u32 8388608, %v525_v51  ;;  %v528_v13 = vadd.s32 1, %v1384_v39  ;;  %v2027_v33 = vadd.f32 %v288_v46, %v266_v2  ;;  %v494_v27 = vand.u32 2147483647, %v493_v52 }
  0xeb   : > { %v2029_v16 = vsub.s32 %v682_v58, %v685_v63  ;;  %v847_v43 = vshll.u32 %v1653_v4, %v844_v44  ;;  %v848_v50 = vshrl.u32 %v1654_v6, %v845_v5  ;;  %v850_v31 = vshll.u32 %v1654_v6, %v844_v44 }
  0xec   : > { %v851_v18 = vshrl.u32 %v1655_v8, %v845_v5  ;;  %v853_v14 = vshll.u32 %v1655_v8, %v844_v44  ;;  %v854_v20 = vshrl.u32 %v1656_v10, %v845_v5  ;;  %v496_v26 = vcvt.s32.f32 %v489_v0 }
  0xed   : > { %v688_v22 = vsub.s32 0, %v2029_v16  ;;  %v856_v2 = vshll.u32 %v1656_v10, %v844_v44  ;;  %v857_v23 = vshrl.u32 %v1657_v15, %v845_v5  ;;  %v849_v24 = vor.u32 %v848_v50, %v847_v43 }
  0xee   : > { %v852_v58 = vor.u32 %v851_v18, %v850_v31  ;;  %v855_v25 = vor.u32 %v854_v20, %v853_v14  ;;  %v2040_v32 = vshll.u32 %v526_v12, 8  ;;  %v859_v21 = vshll.u32 %v1657_v15, %v844_v44 }
  0xef   : > { %v1389_v36 = vmin.u32 %v688_v22, %v2029_v16  ;;  %v858_v37 = vor.u32 %v857_v23, %v856_v2  ;;  %v860_v56 = vshrl.u32 %v1658_v19, %v845_v5  ;;  %v497_v60 = vmul.f32 %v496_v26, %v494_v27 }
  0xf0   : > { %v846_v39 = vshrl.u32 %v1653_v4, %v845_v5  ;;  %vm862_vm9 = vcmp.lt.s32.totalorder %v843_v7, 1  ;;  %vm529_vm10 = vcmp.gt.s32.totalorder %v528_v13, 0  ;;  %vm863_vm11 = vcmp.lt.s32.totalorder %v843_v7, 2 }
  0xf1   : > { %v690_v51 = vclz %v1389_v36  ;;  %v861_v55 = vor.u32 %v860_v56, %v859_v21  ;;  %vm865_vm12 = vcmp.lt.s32.totalorder %v843_v7, 4  ;;  %vm864_vm13 = vcmp.lt.s32.totalorder %v843_v7, 3 }
  0xf2   : > { %v867_v52 = vsel %vm865_vm12, %v855_v25, 2102212464  ;;  %v870_v46 = vsel %vm862_vm9, %v849_v24, %v852_v58  ;;  %v871_v0 = vsel %vm865_vm12, %v858_v37, 920167782  ;;  %v866_v12 = vsel %vm862_vm9, %v846_v39, %v849_v24 }
  0xf3   : > { %v1390_v63 = vadd.s32 4294967294, %v690_v51  ;;  %v872_v43 = vsel %vm864_vm13, %v855_v25, %v871_v0  ;;  %v874_v50 = vsel %vm862_vm9, %v852_v58, %v855_v25  ;;  %v868_v44 = vsel %vm864_vm13, %v852_v58, %v867_v52 }
  0xf4   : > { %v873_v31 = vsel %vm863_vm11, %v870_v46, %v872_v43  ;;  %v875_v27 = vsel %vm865_vm12, %v861_v55, 1326507024  ;;  %v530_v5 = vsel %vm529_vm10, %v528_v13, 0  ;;  %v498_v26 = vxor.u32 2147483648, %v497_v60 }
  0xf5   : > { %vm1391_vm14 = vcmp.lt.s32.totalorder %v1390_v63, 0  ;;  %v876_v18 = vsel %vm864_vm13, %v858_v37, %v875_v27  ;;  %v2049_v14 = vmul.u32.u64.low %v2025_v42, %v873_v31  ;;  %v2050_v20 = vmul.u32.u64.high %v2025_v42, %v873_v31, %v2049_v14 }
  0xf6   : > { %v693_v22 = vsel %vm1391_vm14, 0, %v1390_v63  ;;  %v877_v2 = vsel %vm863_vm11, %v874_v50, %v876_v18  ;;  %v2054_v23 = vshrl.u32 %v530_v5, 5  ;;  %v869_v25 = vsel %vm863_vm11, %v866_v12, %v868_v44 }
  0xf7   : > { %v694_v24 = vsub.s32 32, %v693_v22  ;;  %v698_v58 = vsub.s32 4294967266, %v693_v22  ;;  %v532_v36 = vand.u32 31, %v530_v5  ;;  %v695_v13 = vshll.u32 %v2029_v16, %v693_v22 }
  0xf8   : > { %v708_v37 = vsub.s32 4, %v2007_v40  ;;  %v2060_v21 = vmul.u32.u64.low %v2025_v42, %v877_v2  ;;  %v2061_v56 = vmul.u32.u64.high %v2025_v42, %v877_v2, %v2060_v21  ;;  %v888_v55 = vadd.s32 1, %v2050_v20 }
  0xf9   : > { %v696_v39 = vshrl.u32 %v2018_v62, %v694_v24  ;;  %v699_v51 = vadd.s32 127, %v698_v58  ;;  %v533_v52 = vsub.s32 32, %v532_v36  ;;  %v499_v46 = vsel %vm416_vm4, %v498_v26, %v497_v60 }
  0xfa   : > { %v885_v7 = vmul.u32 %v2025_v42, %v869_v25  ;;  %v535_v0 = vshll.u32 %v1653_v4, %v532_v36  ;;  %vm550_vm15 = vcmp.lt.s32.totalorder %v2054_v23, 1  ;;  %v538_v43 = vshll.u32 %v1654_v6, %v532_v36 }
  0xfb   : > { %v697_v16 = vor.u32 %v696_v39, %v695_v13  ;;  %v700_v63 = vshll.u32 %v699_v51, 23  ;;  %v536_v12 = vshrl.u32 %v1654_v6, %v533_v52  ;;  %vm887_vm0 = vc.u32 %v2061_v56, %v2049_v14 }
  0xfc   : > { %v539_v62 = vshrl.u32 %v1655_v8, %v533_v52  ;;  %v541_v50 = vshll.u32 %v1655_v8, %v532_v36  ;;  %v542_v60 = vshrl.u32 %v1656_v10, %v533_v52  ;;  %v889_v44 = vsel %vm887_vm0, %v888_v55, %v2050_v20 }
  0xfd   : > { %v701_v42 = vor.u32 4788187, %v700_v63  ;;  %v537_v31 = vor.u32 %v536_v12, %v535_v0  ;;  %v544_v27 = vshll.u32 %v1656_v10, %v532_v36  ;;  %vm624_vm1 = vcmp.lt.s32.totalorder %v1791_v3, 0 }
  0xfe   : > { %v890_v5 = vadd.s32 %v889_v44, %v885_v7  ;;  %v540_v18 = vor.u32 %v539_v62, %v538_v43  ;;  %v543_v26 = vor.u32 %v542_v60, %v541_v50  ;;  %v545_v22 = vshrl.u32 %v1657_v15, %v533_v52 }
  0xff   : > { %v702_v2 = vand.u32 2147483647, %v701_v42  ;;  %v704_v24 = vcvt.s32.f32 %v697_v16  ;;  %v547_v58 = vshll.u32 %v1657_v15, %v532_v36  ;;  %v548_v25 = vshrl.u32 %v1658_v19, %v533_v52 }
 0x100   : > { %v891_v13 = vadd.s32 536870912, %v890_v5  ;;  %v534_v21 = vshrl.u32 %v1653_v4, %v533_v52  ;;  %v546_v20 = vor.u32 %v545_v22, %v544_v27  ;;  %vm553_vm2 = vcmp.lt.s32.totalorder %v2054_v23, 4 }
 0x101   : > { %vm2087_vm4 = vcmp.le.f32.partialorder %v622_v59, 0.7853982  ;;  %v705_v51 = vmul.f32 %v704_v24, %v702_v2  ;;  %v549_v55 = vor.u32 %v548_v25, %v547_v58  ;;  %v555_v7 = vsel %vm553_vm2, %v543_v26, 2102212464 }
 0x102   : > { %v558_v36 = vsel %vm550_vm15, %v537_v31, %v540_v18  ;;  %v892_v0 = vshrl.u32 %v891_v13, 30  ;;  %vm552_vm5 = vcmp.lt.s32.totalorder %v2054_v23, 3  ;;  %v559_v16 = vsel %vm553_vm2, %v546_v20, 920167782 }
 0x103   : > { %v562_v52 = vsel %vm550_vm15, %v540_v18, %v543_v26  ;;  %vm551_vm6 = vcmp.lt.s32.totalorder %v2054_v23, 2  ;;  %v554_v59 = vsel %vm550_vm15, %v534_v21, %v537_v31  ;;  %v560_v63 = vsel %vm552_vm5, %v543_v26, %v559_v16  ;;  %v296_v21 = vpop.permute.xlu1 %295 }
 0x104   : > { %v563_v12 = vsel %vm553_vm2, %v549_v55, 1326507024  ;;  %v893_v43 = vshll.u32 %v892_v0, 30  ;;  %v556_v62 = vsel %vm552_vm5, %v540_v18, %v555_v7  ;;  %v561_v50 = vsel %vm551_vm6, %v558_v36, %v560_v63 }
 0x105   : > { %v564_v60 = vsel %vm552_vm5, %v546_v20, %v563_v12  ;;  %v706_v42 = vxor.u32 2147483648, %v705_v51  ;;  %v2104_v27 = vmul.u32.u64.low %v2040_v32, %v561_v50  ;;  %v2105_v22 = vmul.u32.u64.high %v2040_v32, %v561_v50, %v2104_v27 }
 0x106   : > { %v565_v44 = vsel %vm551_vm6, %v562_v52, %v564_v60  ;;  %v2112_v31 = vadd.s32 3, %v399_v53  ;;  %v2118_v18 = vadd.s32 3, %v503_v61  ;;  %vm832_vm8 = vcmp.lt.s32.totalorder %v1923_v11, 0 }
 0x107   : > { %v2121_v26 = vsub.s32 %v890_v5, %v893_v43  ;;  %1554 = vcosq.f32 %v2012_v47  ;;  %v709_v57 = vsel %vm624_vm1, %v708_v37, %v2007_v40  ;;  %vm2129_vm3 = vcmp.le.f32.partialorder %v830_v54, 0.7853982 }
 0x108   : > { %v2134_v34 = vmul.u32.u64.low %v2040_v32, %v565_v44  ;;  %v2135_v53 = vmul.u32.u64.high %v2040_v32, %v565_v44, %v2134_v34  ;;  %v502_v61 = vsel %vm1990_vm7, %v1781_v49, %v499_v46  ;;  %v557_v2 = vsel %vm551_vm6, %v554_v59, %v556_v62 }
 0x109   : > { %v896_v5 = vsub.s32 0, %v2121_v26  ;;  %v726_v40 = vand.u32 2147483647, %v2027_v33  ;;  %v707_v54 = vsel %vm624_vm1, %v706_v42, %v705_v51  ;;  %v916_v37 = vsub.s32 4, %v892_v0  ;;  %v300_v42 = vpop.permute.xlu1 %299 }
 0x10a   : > { %v576_v24 = vadd.s32 1, %v2105_v22  ;;  %v729_v58 = vand.u32 2139095040, %v2027_v33  ;;  %1556 = vsinq.f32 %v2012_v47  ;;  %v711_v41 = vsel %vm2087_vm4, 0, %v709_v57 }
 0x10b   : > { %v1397_v46 = vmin.u32 %v896_v5, %v2121_v26  ;;  %v221_v23 = vmul.f32 %v1950_v45, %v1763_v30  ;;  %1558 = vcosq.f32 %v502_v61  ;;  %v573_v25 = vmul.u32 %v2040_v32, %v557_v2 }
 0x10c   : > { %vm575_vm7 = vc.u32 %v2135_v53, %v2104_v27  ;;  %v730_v13 = vshrl.u32 %v729_v58, 23  ;;  %v710_v47 = vsel %vm2087_vm4, %v1791_v3, %v707_v54  ;;  %v268_v55 = vadd.f32 %v1892_v17, %v2022_v9  ;;  %v1157_v58 = vld [vmem:[%s2593_s1 + $0x18] sm:$0xff] }
 0x10d   : > { %v898_v20 = vclz %v1397_v46  ;;  %v577_v51 = vsel %vm575_vm7, %v576_v24, %v2105_v22  ;;  %v917_v30 = vsel %vm832_vm8, %v916_v37, %v892_v0  ;;  %v733_v7 = vand.u32 8388607, %v726_v40  ;;  %v1156_v24 = vld [vmem:[%s2593_s1 + $0x10] sm:$0xff] }
 0x10e   : > { %v578_v45 = vadd.s32 %v577_v51, %v573_v25  ;;  %v1392_v32 = vadd.s32 4294967169, %v730_v13  ;;  %1560 = vsinq.f32 %v502_v61  ;;  %v261_v39 = vmul.f32 %v1977_v48, %v1761_v29 }
 0x10f   : > { %v1398_v36 = vadd.s32 4294967294, %v898_v20  ;;  %v2169_v16 = vadd.f32 %v296_v21, %v268_v55  ;;  %1562 = vcosq.f32 %v710_v47  ;;  %v2171_v52 = vadd.s32 3, %v711_v41 }
 0x110   : > { %v579_v59 = vadd.s32 536870912, %v578_v45  ;;  %v736_v17 = vadd.s32 1, %v1392_v32  ;;  %1564 = vsinq.f32 %v710_v47  ;;  %v886_v9 = vadd.s32 %v2049_v14, %v2061_v56  ;;  %v1155_v14 = vld [vmem:[%s2593_s1 + $0x8] sm:$0xff]  ;;  %v1154_v56 = vld [vmem:[%s2593_s1] sm:$0xff] }
 0x111   : > { %vm1399_vm9 = vcmp.lt.s32.totalorder %v1398_v36, 0  ;;  %v919_v0 = vsel %vm2129_vm3, 0, %v917_v30  ;;  %v2177_v63 = vpop.eup %1554  ;;  %v734_v29 = vor.u32 8388608, %v733_v7  ;;  %v937_v60 = vand.u32 2139095040, %v2169_v16  ;;  %1169 = vperm.xlu1 %1549, %v1155_v14   ;;  %1164 = vperm.xlu0 %1548, %v1154_v56  }
 0x112   : > { %v901_v12 = vsel %vm1399_vm9, 0, %v1398_v36  ;;  %v2179_v43 = vshrl.u32 %v579_v59, 30  ;;  %vm737_vm10 = vcmp.gt.s32.totalorder %v736_v17, 0  ;;  %v2188_v44 = vadd.s32 3, %v919_v0  ;;  %v1159_v59 = vld [vmem:[%s2593_s1 + $0x28] sm:$0xff] }
 0x113   : > { %v902_v48 = vsub.s32 32, %v901_v12  ;;  %v906_v62 = vsub.s32 4294967266, %v901_v12  ;;  %v738_v50 = vsel %vm737_vm10, %v736_v17, 0  ;;  %v269_v34 = vadd.f32 %v261_v39, %v221_v23  ;;  %v1158_v39 = vld [vmem:[%s2593_s1 + $0x20] sm:$0xff] }
 0x114   : > { %v581_v22 = vshll.u32 %v2179_v43, 30  ;;  %v740_v57 = vand.u32 31, %v738_v50  ;;  %v2191_v61 = vpop.eup %1556  ;;  %v903_v5 = vshll.u32 %v2121_v26, %v901_v12  ;;  %v2196_v37 = vadd.s32 %v2104_v27, %v2135_v53 }
 0x115   : > { %v904_v2 = vshrl.u32 %v886_v9, %v902_v48  ;;  %v907_v54 = vadd.s32 127, %v906_v62  ;;  %v2204_v41 = vpop.eup %1558  ;;  %v2208_v26 = vshll.u32 %v734_v29, 8  ;;  %v2210_v25 = vadd.f32 %v300_v42, %v269_v34  ;;  %1174 = vperm.xlu1 %1549, %v1156_v24   ;;  %1179 = vperm.xlu0 %1548, %v1157_v58   ;;  %v1160_v58 = vld [vmem:[%s2593_s1 + $0x30] sm:$0xff] }
 0x116   : > { %v2206_v46 = vsub.s32 %v578_v45, %v581_v22  ;;  %v741_v23 = vsub.s32 32, %v740_v57  ;;  %v934_v53 = vand.u32 2147483647, %v2169_v16  ;;  %v938_v21 = vshrl.u32 %v937_v60, 23 }
 0x117   : > { %v905_v13 = vor.u32 %v904_v2, %v903_v5  ;;  %v908_v27 = vshll.u32 %v907_v54, 23  ;;  %v2214_v20 = vshrl.u32 %v738_v50, 5  ;;  %v743_v51 = vshll.u32 %v1653_v4, %v740_v57 }
 0x118   : > { %v584_v47 = vsub.s32 0, %v2206_v46  ;;  %v744_v55 = vshrl.u32 %v1654_v6, %v741_v23  ;;  %v2218_v30 = vpop.eup %1560  ;;  %v746_v7 = vshll.u32 %v1654_v6, %v740_v57  ;;  %v747_v36 = vshrl.u32 %v1655_v8, %v741_v23 }
 0x119   : > { %v909_v45 = vor.u32 4788187, %v908_v27  ;;  %v912_v32 = vcvt.s32.f32 %v905_v13  ;;  %v2228_v17 = vpop.eup %1562  ;;  %v749_v12 = vshll.u32 %v1655_v8, %v740_v57  ;;  %v750_v29 = vshrl.u32 %v1656_v10, %v741_v23  ;;  %1184 = vperm.xlu1 %1549, %v1158_v39   ;;  %1189 = vperm.xlu0 %1548, %v1159_v59   ;;  %v1161_v13 = vld [vmem:[%s2593_s1 + $0x38] sm:$0xff] }
 0x11a   : > { %v1385_v9 = vmin.u32 %v584_v47, %v2206_v46  ;;  %v745_v0 = vor.u32 %v744_v55, %v743_v51  ;;  %v2233_v48 = vpop.eup %1564  ;;  %v748_v50 = vor.u32 %v747_v36, %v746_v7  ;;  %v752_v60 = vshll.u32 %v1656_v10, %v740_v57 }
 0x11b   : > { %v910_v62 = vand.u32 2147483647, %v909_v45  ;;  %v753_v42 = vshrl.u32 %v1657_v15, %v741_v23  ;;  %vm520_vm11 = vcmp.lt.s32.totalorder %v1904_v28, 0  ;;  %v751_v56 = vor.u32 %v750_v29, %v749_v12 }
 0x11c   : > { %v586_v14 = vclz %v1385_v9  ;;  %v756_v22 = vshrl.u32 %v1658_v19, %v741_v23  ;;  %v2241_v34 = vand.u32 8388607, %v934_v53  ;;  %v604_v2 = vsub.s32 4, %v2179_v43 }
 0x11d   : > { %v913_v5 = vmul.f32 %v912_v32, %v910_v62  ;;  %v754_v54 = vor.u32 %v753_v42, %v752_v60  ;;  %v755_v24 = vshll.u32 %v1657_v15, %v740_v57  ;;  %v742_v47 = vshrl.u32 %v1653_v4, %v741_v23  ;;  %1194 = vperm.xlu1 %1549, %v1160_v58  }
 0x11e   : > { %v1386_v27 = vadd.s32 4294967294, %v586_v14  ;;  %vm758_vm12 = vcmp.lt.s32.totalorder %v2214_v20, 1  ;;  %vm761_vm13 = vcmp.lt.s32.totalorder %v2214_v20, 4  ;;  %vm760_vm14 = vcmp.lt.s32.totalorder %v2214_v20, 3  ;;  %1199 = vperm.xlu0 %1548, %v1161_v13  }
 0x11f   : > { %v757_v51 = vor.u32 %v756_v22, %v755_v24  ;;  %v766_v57 = vsel %vm758_vm12, %v745_v0, %v748_v50  ;;  %v767_v55 = vsel %vm761_vm13, %v754_v54, 920167782  ;;  %vm2261_vm15 = vcmp.le.f32.partialorder %v518_v1, 0.7853982 }
 0x120   : > { %vm1387_vm0 = vcmp.lt.s32.totalorder %v1386_v27, 0  ;;  %vm759_vm1 = vcmp.lt.s32.totalorder %v2214_v20, 2  ;;  %v763_v23 = vsel %vm761_vm13, %v751_v56, 2102212464  ;;  %v768_v32 = vsel %vm760_vm14, %v751_v56, %v767_v55 }
 0x121   : > { %v914_v7 = vxor.u32 2147483648, %v913_v5  ;;  %v589_v36 = vsel %vm1387_vm0, 0, %v1386_v27  ;;  %v769_v39 = vsel %vm759_vm1, %v766_v57, %v768_v32  ;;  %v1400_v1 = vadd.s32 4294967169, %v938_v21 }
 0x122   : > { %v590_v59 = vsub.s32 32, %v589_v36  ;;  %v594_v9 = vsub.s32 4294967266, %v589_v36  ;;  %v762_v12 = vsel %vm758_vm12, %v742_v47, %v745_v0  ;;  %v770_v29 = vsel %vm758_vm12, %v748_v50, %v751_v56 }
 0x123   : > { %v764_v62 = vsel %vm760_vm14, %v748_v50, %v763_v23  ;;  %v771_v60 = vsel %vm761_vm13, %v757_v51, 1326507024  ;;  %v2281_v42 = vmul.u32.u64.low %v2208_v26, %v769_v39  ;;  %v2282_v14 = vmul.u32.u64.high %v2208_v26, %v769_v39, %v2281_v42 }
 0x124   : > { %v591_v21 = vshll.u32 %v2206_v46, %v589_v36  ;;  %v592_v22 = vshrl.u32 %v2196_v37, %v590_v59  ;;  %v595_v24 = vadd.s32 127, %v594_v9  ;;  %v772_v0 = vsel %vm760_vm14, %v754_v54, %v771_v60 }
 0x125   : > { %v915_v56 = vsel %vm832_vm8, %v914_v7, %v913_v5  ;;  %v605_v50 = vsel %vm520_vm11, %v604_v2, %v2179_v43  ;;  %v773_v58 = vsel %vm759_vm1, %v770_v29, %v772_v0  ;;  %v944_v13 = vadd.s32 1, %v1400_v1 }
 0x126   : > { %v593_v27 = vor.u32 %v592_v22, %v591_v21  ;;  %v596_v47 = vshll.u32 %v595_v24, 23  ;;  %v2297_v46 = vmul.u32.u64.low %v2208_v26, %v773_v58  ;;  %v2298_v37 = vmul.u32.u64.high %v2208_v26, %v773_v58, %v2297_v46 }
 0x127   : > { %v765_v54 = vsel %vm759_vm1, %v762_v12, %v764_v62  ;;  %v784_v51 = vadd.s32 1, %v2282_v14  ;;  %vm945_vm2 = vcmp.gt.s32.totalorder %v944_v13, 0  ;;  %v2304_v5 = vand.u32 3, %v2112_v31 }
 0x128   : > { %v918_v43 = vsel %vm2129_vm3, %v1923_v11, %v915_v56  ;;  %v597_v2 = vor.u32 4788187, %v596_v47  ;;  %v946_v57 = vsel %vm945_vm2, %v944_v13, 0  ;;  %v407_v55 = vxor.u32 2147483648, %v2191_v61 }
 0x129   : > { %v607_v23 = vsel %vm2261_vm15, 0, %v605_v50  ;;  %v942_v20 = vor.u32 8388608, %v2241_v34  ;;  %v948_v32 = vand.u32 31, %v946_v57  ;;  %v1038_v7 = vand.u32 2147483647, %v2210_v25 }
 0x12a   : > { %v598_v36 = vand.u32 2147483647, %v597_v2  ;;  %v600_v39 = vcvt.s32.f32 %v593_v27  ;;  %v781_v31 = vmul.u32 %v2208_v26, %v765_v54  ;;  %vm783_vm4 = vc.u32 %v2298_v37, %v2281_v42 }
 0x12b   : > { %1566 = vcosq.f32 %v918_v43  ;;  %v785_v35 = vsel %vm783_vm4, %v784_v51, %v2282_v14  ;;  %v949_v1 = vsub.s32 32, %v948_v32  ;;  %v1041_v59 = vand.u32 2139095040, %v2210_v25 }
 0x12c   : > { %v601_v9 = vmul.f32 %v600_v39, %v598_v36  ;;  %v786_v12 = vadd.s32 %v785_v35, %v781_v31  ;;  %v947_v29 = vshrl.u32 %v946_v57, 5  ;;  %v951_v34 = vshll.u32 %v1653_v4, %v948_v32 }
 0x12d   : > { %v952_v62 = vshrl.u32 %v1654_v6, %v949_v1  ;;  %v954_v60 = vshll.u32 %v1654_v6, %v948_v32  ;;  %v955_v26 = vshrl.u32 %v1655_v8, %v949_v1  ;;  %v958_v21 = vshrl.u32 %v1656_v10, %v949_v1 }
 0x12e   : > { %v787_v22 = vadd.s32 536870912, %v786_v12  ;;  %v957_v24 = vshll.u32 %v1655_v8, %v948_v32  ;;  %v960_v14 = vshll.u32 %v1656_v10, %v948_v32  ;;  %v961_v0 = vshrl.u32 %v1657_v15, %v949_v1 }
 0x12f   : > { %v602_v56 = vxor.u32 2147483648, %v601_v9  ;;  %v953_v50 = vor.u32 %v952_v62, %v951_v34  ;;  %v956_v58 = vor.u32 %v955_v26, %v954_v60  ;;  %v964_v13 = vshrl.u32 %v1658_v19, %v949_v1 }
 0x130   : > { %vm728_vm5 = vcmp.lt.s32.totalorder %v2027_v33, 0  ;;  %v788_v27 = vshrl.u32 %v787_v22, 30  ;;  %v959_v47 = vor.u32 %v958_v21, %v957_v24  ;;  %v962_v46 = vor.u32 %v961_v0, %v960_v14 }
 0x131   : > { %v963_v54 = vshll.u32 %v1657_v15, %v948_v32  ;;  %1568 = vsinq.f32 %v918_v43  ;;  %v2330_v51 = vadd.s32 3, %v607_v23  ;;  %v982_v2 = vshll.u32 %v942_v20, 8 }
 0x132   : > { %v1045_v57 = vand.u32 8388607, %v1038_v7  ;;  %v789_v36 = vshll.u32 %v788_v27, 30  ;;  %vm966_vm6 = vcmp.lt.s32.totalorder %v947_v29, 1  ;;  %v1042_v31 = vshrl.u32 %v1041_v59, 23 }
 0x133   : > { %v965_v39 = vor.u32 %v964_v13, %v963_v54  ;;  %v603_v35 = vsel %vm520_vm11, %v602_v56, %v601_v9  ;;  %vm2338_vm8 = vcmp.le.f32.partialorder %v726_v40, 0.7853982  ;;  %v950_v43 = vshrl.u32 %v1653_v4, %v949_v1 }
 0x134   : > { %vm969_vm3 = vcmp.lt.s32.totalorder %v947_v29, 4  ;;  %v974_v23 = vsel %vm966_vm6, %v953_v50, %v956_v58  ;;  %v2344_v20 = vsub.s32 %v786_v12, %v789_v36  ;;  %vm968_vm7 = vcmp.lt.s32.totalorder %v947_v29, 3 }
 0x135   : > { %v971_v32 = vsel %vm969_vm3, %v959_v47, 2102212464  ;;  %v975_v62 = vsel %vm969_vm3, %v962_v46, 920167782  ;;  %v2346_v59 = vpop.eup %1566  ;;  %v812_v60 = vsub.s32 4, %v788_v27  ;;  %vm967_vm9 = vcmp.lt.s32.totalorder %v947_v29, 2 }
 0x136   : > { %v976_v9 = vsel %vm968_vm7, %v959_v47, %v975_v62  ;;  %v978_v40 = vsel %vm966_vm6, %v956_v58, %v959_v47  ;;  %v792_v26 = vsub.s32 0, %v2344_v20  ;;  %v970_v21 = vsel %vm966_vm6, %v950_v43, %v953_v50 }
 0x137   : > { %v977_v1 = vsel %vm967_vm9, %v974_v23, %v976_v9  ;;  %v979_v22 = vsel %vm969_vm3, %v965_v39, 1326507024  ;;  %v972_v24 = vsel %vm968_vm7, %v956_v58, %v971_v32  ;;  %v606_v56 = vsel %vm2261_vm15, %v1904_v28, %v603_v35 }
 0x138   : > { %v980_v12 = vsel %vm968_vm7, %v962_v46, %v979_v22  ;;  %v2352_v14 = vmul.u32.u64.low %v982_v2, %v977_v1  ;;  %v2353_v0 = vmul.u32.u64.high %v982_v2, %v977_v1, %v2352_v14  ;;  %v1393_v13 = vmin.u32 %v792_v26, %v2344_v20 }
 0x139   : > { %v981_v47 = vsel %vm967_vm9, %v978_v40, %v980_v12  ;;  %v1404_v54 = vadd.s32 4294967169, %v1042_v31  ;;  %v2363_v50 = vsel %vm728_vm5, %v812_v60, %v788_v27  ;;  %vm406_vm10 = vcmp.eq.s32.totalorder %v2304_v5, 0 }
 0x13a   : > { %v2365_v36 = vmul.u32.u64.low %v982_v2, %v981_v47  ;;  %v2366_v58 = vmul.u32.u64.high %v982_v2, %v981_v47, %v2365_v36  ;;  %v794_v46 = vclz %v1393_v13  ;;  %v973_v39 = vsel %vm967_vm9, %v970_v21, %v972_v24 }
 0x13b   : > { %v1046_v43 = vor.u32 8388608, %v1045_v57  ;;  %v1048_v45 = vadd.s32 1, %v1404_v54  ;;  %v2370_v35 = vpop.eup %1568  ;;  %1570 = vcosq.f32 %v606_v56  ;;  %v782_v31 = vadd.s32 %v2281_v42, %v2298_v37 }
 0x13c   : > { %v992_v23 = vadd.s32 1, %v2353_v0  ;;  %v408_v27 = vsel %vm406_vm10, %v2177_v63, %v407_v55  ;;  %1572 = vsinq.f32 %v606_v56  ;;  %v1394_v32 = vadd.s32 4294967294, %v794_v46 }
 0x13d   : > { %v815_v29 = vsel %vm2338_vm8, 0, %v2363_v50  ;;  %vm1049_vm11 = vcmp.gt.s32.totalorder %v1048_v45, 0  ;;  %vm405_vm12 = vcmp.lt.s32.totalorder %v2304_v5, 2  ;;  %v989_v57 = vmul.u32 %v982_v2, %v973_v39 }
 0x13e   : > { %vm991_vm13 = vc.u32 %v2366_v58, %v2352_v14  ;;  %v1050_v42 = vsel %vm1049_vm11, %v1048_v45, 0  ;;  %v410_v37 = vxor.u32 2147483648, %v2177_v63  ;;  %vm1395_vm14 = vcmp.lt.s32.totalorder %v1394_v32, 0 }
 0x13f   : > { %v993_v62 = vsel %vm991_vm13, %v992_v23, %v2353_v0  ;;  %v1052_v55 = vand.u32 31, %v1050_v42  ;;  %v2386_v60 = vshll.u32 %v1046_v43, 8  ;;  %v797_v9 = vsel %vm1395_vm14, 0, %v1394_v32 }
 0x140   : > { %v994_v40 = vadd.s32 %v993_v62, %v989_v57  ;;  %vm409_vm15 = vcmp.eq.s32.totalorder %v2304_v5, 2  ;;  %v2390_v26 = vand.u32 3, %v2118_v18  ;;  %v798_v2 = vsub.s32 32, %v797_v9 }
 0x141   : > { %v802_v21 = vsub.s32 4294967266, %v797_v9  ;;  %v1053_v1 = vsub.s32 32, %v1052_v55  ;;  %v511_v22 = vxor.u32 2147483648, %v2218_v30  ;;  %v799_v63 = vshll.u32 %v2344_v20, %v797_v9 }
 0x142   : > { %v995_v24 = vadd.s32 536870912, %v994_v40  ;;  %v411_v12 = vsel %vm409_vm15, %v410_v37, %v2191_v61  ;;  %v514_v0 = vxor.u32 2147483648, %v2204_v41  ;;  %v800_v56 = vshrl.u32 %v782_v31, %v798_v2 }
 0x143   : > { %v803_v13 = vadd.s32 127, %v802_v21  ;;  %v1055_v47 = vshll.u32 %v1653_v4, %v1052_v55  ;;  %v1056_v54 = vshrl.u32 %v1654_v6, %v1053_v1  ;;  %v1058_v36 = vshll.u32 %v1654_v6, %v1052_v55 }
 0x144   : > { %v2398_v18 = vshrl.u32 %v995_v24, 30  ;;  %v1059_v46 = vshrl.u32 %v1655_v8, %v1053_v1  ;;  %v1062_v39 = vshrl.u32 %v1656_v10, %v1053_v1  ;;  %v801_v20 = vor.u32 %v800_v56, %v799_v63 }
 0x145   : > { %v804_v43 = vshll.u32 %v803_v13, 23  ;;  %v1061_v61 = vshll.u32 %v1655_v8, %v1052_v55  ;;  %v1065_v45 = vshrl.u32 %v1657_v15, %v1053_v1  ;;  %v2405_v31 = vpop.eup %1570  ;;  %v1051_v32 = vshrl.u32 %v1050_v42, 5 }
 0x146   : > { %v997_v23 = vshll.u32 %v2398_v18, 30  ;;  %v1064_v57 = vshll.u32 %v1656_v10, %v1052_v55  ;;  %v412_v6 = vsel %vm405_vm12, %v408_v27, %v411_v12  ;;  %v2411_v37 = vpop.eup %1572  ;;  %v1057_v9 = vor.u32 %v1056_v54, %v1055_v47 }
 0x147   : > { %v805_v62 = vor.u32 4788187, %v804_v43  ;;  %v1060_v2 = vor.u32 %v1059_v46, %v1058_v36  ;;  %v1063_v21 = vor.u32 %v1062_v39, %v1061_v61  ;;  %v1067_v24 = vshll.u32 %v1657_v15, %v1052_v55 }
 0x148   : > { %v2413_v63 = vsub.s32 %v994_v40, %v997_v23  ;;  %v1066_v8 = vor.u32 %v1065_v45, %v1064_v57  ;;  %v1068_v56 = vshrl.u32 %v1658_v19, %v1053_v1  ;;  %vm510_vm0 = vcmp.eq.s32.totalorder %v2390_v26, 0 }
 0x149   : > { %v806_v42 = vand.u32 2147483647, %v805_v62  ;;  %v808_v10 = vcvt.s32.f32 %v801_v20  ;;  %v1054_v5 = vshrl.u32 %v1653_v4, %v1053_v1  ;;  %vm509_vm1 = vcmp.lt.s32.totalorder %v2390_v26, 2 }
 0x14a   : > { %vm513_vm2 = vcmp.eq.s32.totalorder %v2390_v26, 2  ;;  %v1000_v27 = vsub.s32 0, %v2413_v63  ;;  %v1069_v12 = vor.u32 %v1068_v56, %v1067_v24  ;;  %vm1070_vm4 = vcmp.lt.s32.totalorder %v1051_v32, 1 }
 0x14b   : > { %vm1073_vm6 = vcmp.lt.s32.totalorder %v1051_v32, 4  ;;  %vm506_vm3 = vweird.f32 %v1781_v49  ;;  %v809_v15 = vmul.f32 %v808_v10, %v806_v42  ;;  %vm1071_vm7 = vcmp.lt.s32.totalorder %v1051_v32, 2 }
 0x14c   : > { %v1075_v19 = vsel %vm1073_vm6, %v1063_v21, 2102212464  ;;  %v1078_v55 = vsel %vm1070_vm4, %v1057_v9, %v1060_v2  ;;  %vm402_vm9 = vweird.f32 %v1771_v38  ;;  %v1401_v40 = vmin.u32 %v1000_v27, %v2413_v63 }
 0x14d   : > { %vm1072_vm10 = vcmp.lt.s32.totalorder %v1051_v32, 3  ;;  %v1079_v4 = vsel %vm1073_vm6, %v1066_v8, 920167782  ;;  %v1082_v1 = vsel %vm1070_vm4, %v1060_v2, %v1063_v21  ;;  %v810_v13 = vxor.u32 2147483648, %v809_v15 }
 0x14e   : > { %v1074_v47 = vsel %vm1070_vm4, %v1054_v5, %v1057_v9  ;;  %v1080_v54 = vsel %vm1072_vm10, %v1063_v21, %v1079_v4  ;;  %v1083_v36 = vsel %vm1073_vm6, %v1069_v12, 1326507024  ;;  %v1002_v46 = vclz %v1401_v40 }
 0x14f   : > { %v1076_v39 = vsel %vm1072_vm10, %v1060_v2, %v1075_v19  ;;  %v1081_v20 = vsel %vm1071_vm7, %v1078_v55, %v1080_v54  ;;  %v1084_v43 = vsel %vm1072_vm10, %v1066_v8, %v1083_v36  ;;  %v811_v61 = vsel %vm728_vm5, %v810_v13, %v809_v15 }
 0x150   : > { %v1085_v45 = vsel %vm1071_vm7, %v1082_v1, %v1084_v43  ;;  %v2430_v23 = vmul.u32.u64.low %v2386_v60, %v1081_v20  ;;  %v2431_v57 = vmul.u32.u64.high %v2386_v60, %v1081_v20, %v2430_v23  ;;  %v814_v62 = vsel %vm2338_vm8, %v2027_v33, %v811_v61 }
 0x151   : > { %v1402_v9 = vadd.s32 4294967294, %v1002_v46  ;;  %v2438_v2 = vmul.u32.u64.low %v2386_v60, %v1085_v45  ;;  %v2439_v21 = vmul.u32.u64.high %v2386_v60, %v1085_v45, %v2438_v2  ;;  %1574 = vcosq.f32 %v814_v62 }
 0x152   : > { %v1077_v8 = vsel %vm1071_vm7, %v1074_v47, %v1076_v39  ;;  %v512_v24 = vsel %vm510_vm0, %v2204_v41, %v511_v22  ;;  %v515_v56 = vsel %vm513_vm2, %v514_v0, %v2218_v30  ;;  %1576 = vsinq.f32 %v814_v62 }
 0x153   : > { %vm1403_vm5 = vcmp.lt.s32.totalorder %v1402_v9, 0  ;;  %v516_v42 = vsel %vm509_vm1, %v512_v24, %v515_v56  ;;  %v612_v32 = vand.u32 3, %v2330_v51  ;;  %v1096_v5 = vadd.s32 1, %v2431_v57 }
 0x154   : > { %v1005_v10 = vsel %vm1403_vm5, 0, %v1402_v9  ;;  %v517_v27 = vsel %vm506_vm3, nan, %v516_v42  ;;  %v615_v22 = vxor.u32 2147483648, %v2411_v37  ;;  %v819_v41 = vadd.s32 3, %v815_v29 }
 0x155   : > { %v1010_v30 = vsub.s32 4294967266, %v1005_v10  ;;  %v413_v26 = vsel %vm402_vm9, nan, %v412_v6  ;;  %vm610_vm11 = vweird.f32 %v1904_v28  ;;  %v990_v51 = vadd.s32 %v2352_v14, %v2366_v58 }
 0x156   : > { %v1093_v0 = vmul.u32 %v2386_v60, %v1077_v8  ;;  %vm1095_vm12 = vc.u32 %v2439_v21, %v2430_v23  ;;  %v1142_v49 = vpack.c.bf16 %v517_v27, %v413_v26  ;;  %v1006_v12 = vsub.s32 32, %v1005_v10 }
 0x157   : > { %v1011_v34 = vadd.s32 127, %v1010_v30  ;;  %v1097_v50 = vsel %vm1095_vm12, %v1096_v5, %v2431_v57  ;;  %vm614_vm8 = vcmp.eq.s32.totalorder %v612_v32, 0  ;;  %v618_v6 = vxor.u32 2147483648, %v2405_v31  ;;  %v1550_v5 = vld [vmem:[%s2592_s0] sm:$0xff]  }
 0x158   : > { %v1098_v29 = vadd.s32 %v1097_v50, %v1093_v0  ;;  %1428 = vmatprep.subr.bf16.mxu0 %v1142_v49  ;;  %1444 = vmatprep.subr.bf16.mxu1 %v1142_v49  ;;  %v616_v38 = vsel %vm614_vm8, %v2405_v31, %v615_v22  ;;  %v716_v14 = vand.u32 3, %v2171_v52  ;;  %vm617_vm13 = vcmp.eq.s32.totalorder %v612_v32, 2 }
 0x159   : > { %v1012_v58 = vshll.u32 %v1011_v34, 23  ;;  %1429 = vmatpush3.bf16.msra.mxu0 %v1142_v49  ;;  %1448 = vmatpush3.bf16.msra.mxu1 %v1142_v49  ;;  %v719_v60 = vxor.u32 2147483648, %v2233_v48  ;;  %v722_v15 = vxor.u32 2147483648, %v2228_v17  ;;  %vm613_vm14 = vcmp.lt.s32.totalorder %v612_v32, 2 }
 0x15a   : > { %v1099_v19 = vadd.s32 536870912, %v1098_v29  ;;  %v619_v55 = vsel %vm617_vm13, %v618_v6, %v2411_v37  ;;  %vm718_vm15 = vcmp.eq.s32.totalorder %v716_v14, 0  ;;  %v1007_v40 = vshll.u32 %v2413_v63, %v1005_v10 }
 0x15b   : > { %v1008_v4 = vshrl.u32 %v990_v51, %v1006_v12  ;;  %v620_v1 = vsel %vm613_vm14, %v616_v38, %v619_v55  ;;  %v720_v31 = vsel %vm718_vm15, %v2228_v17, %v719_v60  ;;  %v1575_v52 = vpop.eup %1574  ;;  %vm714_vm0 = vweird.f32 %v1791_v3 }
 0x15c   : > { %v2480_v13 = vshrl.u32 %v1099_v19, 30  ;;  %vm717_vm1 = vcmp.lt.s32.totalorder %v716_v14, 2  ;;  %vm721_vm2 = vcmp.eq.s32.totalorder %v716_v14, 2  ;;  %v1577_v47 = vpop.eup %1576  ;;  %v1013_v54 = vor.u32 4788187, %v1012_v58 }
 0x15d   : > { %v621_v36 = vsel %vm610_vm11, nan, %v620_v1  ;;  %v723_v37 = vsel %vm721_vm2, %v722_v15, %v2233_v48  ;;  %v820_v46 = vand.u32 3, %v819_v41  ;;  %v823_v20 = vxor.u32 2147483648, %v1577_v47 }
 0x15e   : > { %v1101_v63 = vshll.u32 %v2480_v13, 30  ;;  %v724_v39 = vsel %vm717_vm1, %v720_v31, %v723_v37  ;;  %v826_v17 = vxor.u32 2147483648, %v1575_v52  ;;  %v1009_v43 = vor.u32 %v1008_v4, %v1007_v40 }
 0x15f   : > { %v725_v61 = vsel %vm714_vm0, nan, %v724_v39  ;;  %vm822_vm4 = vcmp.eq.s32.totalorder %v820_v46, 0  ;;  %v1014_v62 = vand.u32 2147483647, %v1013_v54  ;;  %vm825_vm6 = vcmp.eq.s32.totalorder %v820_v46, 2 }
 0x160   : > { %v1102_v45 = vsub.s32 %v1098_v29, %v1101_v63  ;;  %v1143_v3 = vpack.c.bf16 %v725_v61, %v621_v36  ;;  %v824_v57 = vsel %vm822_vm4, %v1575_v52, %v823_v20  ;;  %vm821_vm3 = vcmp.lt.s32.totalorder %v820_v46, 2 }
 0x161   : > { %v827_v28 = vsel %vm825_vm6, %v826_v17, %v1577_v47  ;;  %v924_v48 = vand.u32 3, %v2188_v44  ;;  %v1016_v2 = vcvt.s32.f32 %v1009_v43  ;;  %v927_v24 = vxor.u32 2147483648, %v2370_v35  ;;  %v1551_v44 = vld [vmem:[%s2592_s0 + $0x10] sm:$0xff]  }
 0x162   : > { %v1104_v9 = vsub.s32 0, %v1102_v45  ;;  %1430 = vmatprep.subr.bf16.mxu0 %v1143_v3  ;;  %1445 = vmatprep.subr.bf16.mxu1 %v1143_v3  ;;  %v828_v8 = vsel %vm821_vm3, %v824_v57, %v827_v28  ;;  %v930_v56 = vxor.u32 2147483648, %v2346_v59  ;;  %vm818_vm7 = vweird.f32 %v2027_v33 }
 0x163   : > { %1431 = vmatpush3.bf16.msra.mxu0 %v1143_v3  ;;  %1449 = vmatpush3.bf16.msra.mxu1 %v1143_v3  ;;  %v1017_v32 = vmul.f32 %v1016_v2, %v1014_v62  ;;  %v829_v10 = vsel %vm818_vm7, nan, %v828_v8  ;;  %vm926_vm9 = vcmp.eq.s32.totalorder %v924_v48, 0  ;;  %vm929_vm10 = vcmp.eq.s32.totalorder %v924_v48, 2  ;;  %v1552_v8 = vld [vmem:[%s2592_s0 + $0x8] sm:$0xff]  }
 0x164   : > { %v1405_v42 = vmin.u32 %v1104_v9, %v1102_v45  ;;  %vm925_vm5 = vcmp.lt.s32.totalorder %v924_v48, 2  ;;  %v928_v22 = vsel %vm926_vm9, %v2346_v59, %v927_v24  ;;  %v931_v41 = vsel %vm929_vm10, %v930_v56, %v2370_v35  ;;  %v1553_v24 = vld [vmem:[%s2592_s0 + $0x18] sm:$0xff]  }
 0x165   : > { %vm922_vm11 = vweird.f32 %v1923_v11  ;;  %v932_v33 = vsel %vm925_vm5, %v928_v22, %v931_v41  ;;  %vm1222_vm12 = vcmask 523264   ;;  %v1018_v0 = vxor.u32 2147483648, %v1017_v32 }
 0x166   : > { %v1106_v27 = vclz %v1405_v42  ;;  %v933_v26 = vsel %vm922_vm11, nan, %v932_v33  ;;  %1436 = vmatprep.mubr.msk.bf16.mxu0 %vm1222_vm12, %v1550_v5  ;;  %1440 = vmatprep.mubr.msk.bf16.mxu1 %vm1222_vm12, %v1551_v44  ;;  %v1094_v59 = vadd.s32 %v2430_v23, %v2439_v21  ;;  %vm936_vm13 = vcmp.lt.s32.totalorder %v2169_v16, 0 }
 0x167   : > { %v1144_v51 = vpack.c.bf16 %v933_v26, %v829_v10  ;;  %v1019_v11 = vsel %vm936_vm13, %v1018_v0, %v1017_v32  ;;  %vm2509_vm14 = vcmp.le.f32.partialorder %v934_v53, 0.7853982  ;;  %v1020_v58 = vsub.s32 4, %v2398_v18 }
 0x168   : > { %v1406_v30 = vadd.s32 4294967294, %v1106_v27  ;;  %v1022_v21 = vsel %vm2509_vm14, %v2169_v16, %v1019_v11  ;;  %v1124_v55 = vsub.s32 4, %v2480_v13  ;;  %vm1040_vm15 = vcmp.lt.s32.totalorder %v2210_v25, 0 }
 0x169   : > { %1432 = vmatprep.subr.bf16.mxu0 %v1144_v51  ;;  %1446 = vmatprep.subr.bf16.mxu1 %v1144_v51  ;;  %1578 = vcosq.f32 %v1022_v21  ;;  %v1021_v53 = vsel %vm936_vm13, %v1020_v58, %v2398_v18  ;;  %vm1039_vm0 = vcmp.le.f32.partialorder %v1038_v7, 0.7853982  ;;  %vm1026_vm9 = vweird.f32 %v2169_v16 }
 0x16a   : > { %vm1407_vm8 = vcmp.lt.s32.totalorder %v1406_v30, 0  ;;  %1433 = vmatpush3.bf16.msra.mxu0 %v1144_v51  ;;  %1450 = vmatpush3.bf16.msra.mxu1 %v1144_v51  ;;  %1580 = vsinq.f32 %v1022_v21  ;;  %v1023_v4 = vsel %vm2509_vm14, 0, %v1021_v53  ;;  %v1125_v31 = vsel %vm1040_vm15, %v1124_v55, %v2480_v13 }
 0x16b   : > { %v1109_v49 = vsel %vm1407_vm8, 0, %v1406_v30  ;;  %v1027_v47 = vadd.s32 3, %v1023_v4  ;;  %v1127_v54 = vsel %vm1039_vm0, 0, %v1125_v31  ;;  %vm1130_vm10 = vweird.f32 %v2210_v25 }
 0x16c   : > { %v1110_v35 = vsub.s32 32, %v1109_v49  ;;  %v1114_v12 = vsub.s32 4294967266, %v1109_v49  ;;  %v1111_v34 = vshll.u32 %v1102_v45, %v1109_v49  ;;  %v1131_v37 = vadd.s32 3, %v1127_v54 }
 0x16d   : > { %v1028_v46 = vand.u32 3, %v1027_v47 }
 0x16e   : > { %v1112_v50 = vshrl.u32 %v1094_v59, %v1110_v35  ;;  %v1115_v29 = vadd.s32 127, %v1114_v12  ;;  %v1132_v20 = vand.u32 3, %v1131_v37 }
 0x16f   : > { %vm1030_vm1 = vcmp.eq.s32.totalorder %v1028_v46, 0  ;;  %vm1033_vm2 = vcmp.eq.s32.totalorder %v1028_v46, 2  ;;  %vm1029_vm4 = vcmp.lt.s32.totalorder %v1028_v46, 2 }
 0x170   : > { %v1113_v6 = vor.u32 %v1112_v50, %v1111_v34  ;;  %v1116_v23 = vshll.u32 %v1115_v29, 23  ;;  %vm1137_vm6 = vcmp.eq.s32.totalorder %v1132_v20, 2  ;;  %vm1134_vm3 = vcmp.eq.s32.totalorder %v1132_v20, 0 }
 0x171   : > { %vm1133_vm7 = vcmp.lt.s32.totalorder %v1132_v20, 2 }
 0x172   : > { %v1117_v14 = vor.u32 4788187, %v1116_v23  ;;  %v1120_v15 = vcvt.s32.f32 %v1113_v6 }
 0x173   : > { %v1579_v36 = vpop.eup %1578 }
 0x174   : > { %v1118_v60 = vand.u32 2147483647, %v1117_v14  ;;  %v1581_v18 = vpop.eup %1580  ;;  %v1034_v39 = vxor.u32 2147483648, %v1579_v36 }
 0x175   : > { %v1031_v63 = vxor.u32 2147483648, %v1581_v18 }
 0x176   : > { %v1121_v19 = vmul.f32 %v1120_v15, %v1118_v60  ;;  %v1035_v43 = vsel %vm1033_vm2, %v1034_v39, %v1581_v18 }
 0x177   : > { %v1032_v7 = vsel %vm1030_vm1, %v1579_v36, %v1031_v63 }
 0x178   : > { %v1122_v40 = vxor.u32 2147483648, %v1121_v19  ;;  %v1036_v3 = vsel %vm1029_vm4, %v1032_v7, %v1035_v43 }
 0x179   : > { %v1037_v28 = vsel %vm1026_vm9, nan, %v1036_v3 }
 0x17a   : > { %v1123_v1 = vsel %vm1040_vm15, %v1122_v40, %v1121_v19 }
 0x17b   : > { %v1126_v52 = vsel %vm1039_vm0, %v2210_v25, %v1123_v1 }
 0x17c   : > { %1582 = vcosq.f32 %v1126_v52 }
 0x17d   : > { %1584 = vsinq.f32 %v1126_v52 }
 0x186   : > { %v1583_v17 = vpop.eup %1582 }
 0x187   : > { %v1585_v61 = vpop.eup %1584  ;;  %v1138_v13 = vxor.u32 2147483648, %v1583_v17 }
 0x188   : > { %v1135_v45 = vxor.u32 2147483648, %v1585_v61 }
 0x189   : > { %v1139_v57 = vsel %vm1137_vm6, %v1138_v13, %v1585_v61 }
 0x18a   : > { %v1136_v62 = vsel %vm1134_vm3, %v1583_v17, %v1135_v45 }
 0x18b   : > { %v1140_v9 = vsel %vm1133_vm7, %v1136_v62, %v1139_v57 }
 0x18c   : > { %v1141_v48 = vsel %vm1130_vm10, nan, %v1140_v9 }
 0x18d   : > { %v1145_v2 = vpack.c.bf16 %v1141_v48, %v1037_v28 }
 0x18f   : > { %1434 = vmatprep.subr.bf16.mxu0 %v1145_v2  ;;  %1447 = vmatprep.subr.bf16.mxu1 %v1145_v2 }
 0x190   : > { %1435 = vmatpush3.bf16.msra.mxu0 %v1145_v2  ;;  %1451 = vmatpush3.bf16.msra.mxu1 %v1145_v2  ;;  %v1170_v16 = vpop.permute.xlu1 %1169  ;;  %v1165_v25 = vpop.permute.xlu0 %1164 }
 0x193   : > { %1437 = vmatmul.mubr.msk.bf16.vlgmr.msra.gmra.mrb[0].mxu0 %vm1222_vm12, %v1552_v8  ;;  %1441 = vmatmul.mubr.msk.bf16.vlgmr.msra.gmra.mrb[0].mxu1 %vm1222_vm12, %v1553_v24 }
 0x194   : > { %v1175_v56 = vpop.permute.xlu1 %1174  ;;  %v1180_v42 = vpop.permute.xlu0 %1179 }
 0x198   : > { %v1185_v32 = vpop.permute.xlu1 %1184  ;;  %v1190_v10 = vpop.permute.xlu0 %1189 }
 0x19c   : > { %v1195_v5 = vpop.permute.xlu1 %1194 }
 0x19d   : > { %v1200_v44 = vpop.permute.xlu0 %1199 }
 0x266   : > { %v1438_v27 = vpop.f32.mrb[0].mxu0  ;;  %v1442_v22 = vpop.f32.mrb[0].mxu1 }
 0x267   : > { %v1278_v41 = vadd.f32 %v1438_v27, %v1175_v56  ;;  %v1294_v33 = vadd.f32 %v1442_v22, %v1195_v5  ;;  %v1269_v30 = vpop.f32.mrb[1].mxu0  ;;  %v1285_v26 = vpop.f32.mrb[1].mxu1 }
 0x268   : > { %v1270_v51 = vadd.f32 %v1269_v30, %v1165_v25  ;;  %v1286_v0 = vadd.f32 %v1285_v26, %v1185_v32  ;;  %v1439_v49 = vpop.f32.mrb[2].mxu0  ;;  %v1443_v59 = vpop.f32.mrb[2].mxu1 }
 0x269   : > { %1302 = vst [vmem:[%s148_s4 + $0x10] sm:$0xff] %v1278_v41  ;;  %1306 = vst [vmem:[%s148_s4 + $0x30] sm:$0xff] %v1294_v33  ;;  %v1281_v35 = vadd.f32 %v1439_v49, %v1180_v42  ;;  %v1297_v12 = vadd.f32 %v1443_v59, %v1200_v44  ;;  %v1272_v11 = vpop.f32.mrb[3].mxu0  ;;  %v1288_v34 = vpop.f32.mrb[3].mxu1 }
 0x26a   : > { %1300 = vst [vmem:[%s148_s4] sm:$0xff] %v1270_v51  ;;  %1304 = vst [vmem:[%s148_s4 + $0x20] sm:$0xff] %v1286_v0  ;;  %v1273_v50 = vadd.f32 %v1272_v11, %v1170_v16  ;;  %v1289_v29 = vadd.f32 %v1288_v34, %v1190_v10 }
 0x26b   : > { %1303 = vst [vmem:[%s148_s4 + $0x18] sm:$0xff] %v1281_v35  ;;  %1307 = vst [vmem:[%s148_s4 + $0x38] sm:$0xff] %v1297_v12 }
 0x26c   : > { %1301 = vst [vmem:[%s148_s4 + $0x8] sm:$0xff] %v1273_v50  ;;  %1305 = vst [vmem:[%s148_s4 + $0x28] sm:$0xff] %v1289_v29 }
 0x26d   : > { %1599 = shalt.err (!%p1596_p2)
}
 0x26e   : > { %s1600_s20 = scalar_lea.hbm %s2545_s8, 1024  ;;  %s1604_s25 = scalar_lea.hbm %s2595_s3, 2048 }
 0x26f   : > { %p1601_p3 = scmp.ne.s32.totalorder %s2545_s8, %s1600_s20  ;;  %p1605_p8 = scmp.lt.u32.totalorder %s2545_s8, %s2595_s3 }
 0x270   : > { %p1606_p9 = scmp.lt.u32.totalorder %s1604_s25, %s1600_s20  ;;  %p1608_p11 = scmp.lt.u32.totalorder %s1600_s20, %s2545_s8 }
 0x271   : > { %p1602_p4 = pnand %p1601_p3, %p1720_p5 }
 0x272   : > { %p1607_p10 = por %p1606_p9, %p1605_p8 }
 0x273   : > { %p1603_p7 = pneg %p1602_p4 }
 0x274   : > { %p1609_p12 = por %p1608_p11, %p1607_p10 }
 0x276   : > { %p1610_p13 = pnand %p1609_p12, %p1603_p7 }
 0x278   : > { %1613 = shalt.err (!%p1610_p13)
}
 0x279   : > { %s1660_s28 = smov 128   ;;  %s1661_s29 = smov 256  }
 0x27a   : > { %s1662_s30 = smov 8  }
 0x27b   : > { %1484 = dma.vmem_to_hbm [thread:$0]  (%p1720_p5), %s2547_s5, 1024, %s2545_s8, %s2551_s19, %s1660_s28, %s1661_s29, %s1662_s30  }
 0x27c PF: > { %p1490_p0 = scmp.ge.s32.totalorder %s1648_s15, 2  ;;  %s1336_s4 = sand.u32 1, %s1636_s12  }
 0x27d   : > { %s1337_s6 = scalar_lea.sflag [#allocation3], %s1336_s4 }
 0x27e   : > { %p1487_p1 = pnand %p1490_p0, %p1724_p6 }
 0x280   : > { %1631 = dma.done.wait (!%p1487_p1), %s1337_s6, 1024  }
 0x281   : > { %1633 = vsyncadd (!%p1487_p1), %s1337_s6, 4294966272  ;;  %p13_p2 = scmp.ge.s32.totalorder %s1706_s18, 4   ;;  %s2612_s12 = smov %s1640_s13 }
 0x282   : > { %s2613_s13 = smov %s1644_s14  ;;  %s2614_s14 = smov %s1718_s21 }
 0x283   : > { %s2615_s15 = smov %s1706_s18  ;;  %15 = sbr.rel (!%p13_p2) target bundleno = 3 (0x3), region = 64 }
 0x28a   :  { %1342 = vsyncpa [#allocation3], 1 }
 0x28b   :  { %1344 = vsyncpa [#allocation3 + $0x1], 1 }

</bundles_post_ra>
